<compile_context>
chip_gen: v5e
topology: v5e:2x2
jax: 0.10.0
libtpu: 0.0.40
codegen_flags: <defaults>
</compile_context>

<pallas_src>
import functools

import jax
import jax.numpy as jnp
from jax.experimental import pallas as pl
from jax.experimental.pallas import tpu as pltpu


def _round_up(x, m):
    return (x + m - 1) // m * m


def _gru_kernel(gi_ref, whhT_ref, bhn_ref, h0_ref, y_ref, hn_ref, h_scr):
    """One grid step = Tc timesteps of the GRU recurrence for one batch shard.

    gi_ref:   (Tc, Bs, 3Hp) f32   precomputed x@W_ih^T + b_ih (+ b_hh_r/z), time-major
    whhT_ref: (Hp, 3Hp)     bf16  recurrent weight (resident across the grid)
    bhn_ref:  (1, Hp)       f32   b_hh_n (must be inside the r-multiply)
    h0_ref:   (Bs, Hp)            initial hidden state for this batch shard
    y_ref:    (Tc, Bs, Hp)        per-timestep outputs (time-major)
    hn_ref:   (Bs, Hp)            final hidden state (resident accumulator over chunks)
    h_scr:    (Bs, Hp)      f32   carried hidden state across time chunks
    """
    c = pl.program_id(1)

    @pl.when(c == 0)
    def _():
        h_scr[...] = h0_ref[...].astype(jnp.float32)

    Tc = gi_ref.shape[0]
    Hp = h_scr.shape[-1]
    mm_dtype = whhT_ref.dtype
    b_hn = bhn_ref[...]                                    # (1, Hp) f32, hoisted

    h = h_scr[...]                                         # (Bs, Hp) f32, lives in vregs
    for j in range(Tc):                                    # static, fully unrolled
        gi = gi_ref[j]                                     # (Bs, 3Hp) f32, lane-aligned slices
        gh = jnp.dot(h.astype(mm_dtype), whhT_ref[...],
                     preferred_element_type=jnp.float32)   # (Bs, 3Hp) f32 on the MXU
        r = jax.nn.sigmoid(gi[:, 0:Hp] + gh[:, 0:Hp])
        z = jax.nn.sigmoid(gi[:, Hp:2 * Hp] + gh[:, Hp:2 * Hp])
        n = jnp.tanh(gi[:, 2 * Hp:3 * Hp] + r * (gh[:, 2 * Hp:3 * Hp] + b_hn))
        # Keep the (1-z)*n + z*h form: with z forced to 1 on padded timesteps this
        # freezes h bit-exactly (VPU has slack here; the serial matmul chain dominates).
        h = (1.0 - z) * n + z * h
        y_ref[j] = h.astype(y_ref.dtype)                   # full-tile, lane-dense store

    h_scr[...] = h

    @pl.when(c == pl.num_programs(1) - 1)
    def _():
        hn_ref[...] = h.astype(hn_ref.dtype)


@functools.partial(jax.jit, static_argnames=("time_chunk",))
def gru_forward(states, hidden, w_ih, w_hh, b_ih, b_hh, *, time_chunk=8):
    """Matches PyTorch nn.GRU(batch_first=True, num_layers=1) forward.

    states: (B, T, I), hidden: (1, B, H)
    w_ih: (3H, I), w_hh: (3H, H), b_ih: (3H,), b_hh: (3H,)
    returns (output (B, T, H), h_n (1, B, H))
    """
    B, T, I = states.shape
    H = hidden.shape[-1]

    Hp = _round_up(H, 128)          # lane-aligned per-gate width
    Bp = _round_up(B, 8)            # sublane-aligned batch
    Tc = min(int(time_chunk), T)    # timesteps per grid step
    Tp = _round_up(T, Tc)
    n_chunks = Tp // Tc

    # Split the batch across two TensorCores (v7x megacore) when large enough.
    n_bshards = 2 if (Bp >= 16 and Bp % 16 == 0) else 1
    Bs = Bp // n_bshards

    f32 = jnp.float32

    # ---- pad weights per-gate to Hp lanes (padding lanes stay exactly zero) ----
    w_ih_p = jnp.zeros((3, Hp, I), f32).at[:, :H, :].set(w_ih.reshape(3, H, I).astype(f32))
    wihT_p = w_ih_p.reshape(3 * Hp, I).T                    # (I, 3Hp)

    w_hh_p = jnp.zeros((3, Hp, Hp), f32).at[:, :H, :H].set(w_hh.reshape(3, H, H).astype(f32))
    whhT_bf16 = w_hh_p.reshape(3 * Hp, Hp).T.astype(jnp.bfloat16)   # (Hp, 3Hp) resident weight

    b_ih_p = jnp.zeros((3, Hp), f32).at[:, :H].set(b_ih.reshape(3, H).astype(f32))
    b_hh_p = jnp.zeros((3, Hp), f32).at[:, :H].set(b_hh.reshape(3, H).astype(f32))
    # Fold b_hh_r and b_hh_z into the gi bias; only b_hh_n must stay inside the recurrence.
    gi_bias = (b_ih_p.at[0].add(b_hh_p[0]).at[1].add(b_hh_p[1])).reshape(1, 3 * Hp)
    bhh_n = b_hh_p[2].reshape(1, Hp)

    # ---- hoisted input projection: ONE large MXU matmul outside the recurrence ----
    x_p = jnp.zeros((Bp, Tp, I), f32).at[:B, :T, :].set(states.astype(f32))
    x_tm = jnp.transpose(x_p, (1, 0, 2)).reshape(Tp * Bp, I)        # small (I-wide) transpose
    gi = jnp.dot(x_tm, wihT_p, preferred_element_type=f32) + gi_bias
    gi = gi.reshape(Tp, Bp, 3 * Hp)

    # Padded timesteps: force update gate z -> 1 so the hidden state is frozen exactly.
    # Only the padded tail slice of gi is touched (no full-array where).
    if Tp > T:
        gi = gi.at[T:, :, Hp:2 * Hp].set(jnp.float32(1e9))

    h0 = jnp.zeros((Bp, Hp), f32).at[:B, :H].set(hidden[0].astype(f32))

    out_tm, hn = pl.pallas_call(
        _gru_kernel,
        out_shape=(
            jax.ShapeDtypeStruct((Tp, Bp, Hp), states.dtype),   # time-major output
            jax.ShapeDtypeStruct((Bp, Hp), states.dtype),       # final hidden
        ),
        grid_spec=pltpu.PrefetchScalarGridSpec(
            num_scalar_prefetch=0,
            grid=(n_bshards, n_chunks),
            in_specs=[
                pl.BlockSpec((Tc, Bs, 3 * Hp), lambda b, c: (c, b, 0)),  # gi chunk
                pl.BlockSpec((Hp, 3 * Hp), lambda b, c: (0, 0)),         # W_hh^T (bf16, resident)
                pl.BlockSpec((1, Hp), lambda b, c: (0, 0)),              # b_hh_n
                pl.BlockSpec((Bs, Hp), lambda b, c: (b, 0)),             # h0 shard
            ],
            out_specs=[
                pl.BlockSpec((Tc, Bs, Hp), lambda b, c: (c, b, 0)),      # y chunk
                pl.BlockSpec((Bs, Hp), lambda b, c: (b, 0)),             # h_n (resident over c)
            ],
            scratch_shapes=[pltpu.VMEM((Bs, Hp), jnp.float32)],          # carried hidden state
        ),
        compiler_params=pltpu.CompilerParams(
            dimension_semantics=("parallel", "arbitrary"),   # batch shards parallel, time serial
            vmem_limit_bytes=32 * 1024 * 1024,
        ),
    )(gi, whhT_bf16, bhh_n, h0)

    out = jnp.transpose(out_tm[:T, :B, :H], (1, 0, 2))
    return out, hn[:B, :H][None]


def _gru_reference(states, hidden, w_ih, w_hh, b_ih, b_hh):
    """Pure-JAX f32 reference (PyTorch GRU semantics) for validation."""
    H = hidden.shape[-1]

    def step(h, x_t):
        gi = x_t @ w_ih.T + b_ih
        gh = h @ w_hh.T + b_hh
        i_r, i_z, i_n = gi[:, :H], gi[:, H:2 * H], gi[:, 2 * H:]
        h_r, h_z, h_n = gh[:, :H], gh[:, H:2 * H], gh[:, 2 * H:]
        r = jax.nn.sigmoid(i_r + h_r)
        z = jax.nn.sigmoid(i_z + h_z)
        n = jnp.tanh(i_n + r * h_n)
        h_new = (1.0 - z) * n + z * h
        return h_new, h_new

    x_tm = jnp.transpose(states, (1, 0, 2))
    h_last, ys = jax.lax.scan(step, hidden[0], x_tm)
    return jnp.transpose(ys, (1, 0, 2)), h_last[None]


def _run_case(key, B, T, I, H, bias=True):
    k_x, k_h, k_wi, k_wh, k_bi, k_bh = jax.random.split(key, 6)
    states = jax.random.normal(k_x, (B, T, I), dtype=jnp.float32)
    hidden = jax.random.normal(k_h, (1, B, H), dtype=jnp.float32)

    bound = 1.0 / jnp.sqrt(jnp.float32(H))
    w_ih = jax.random.uniform(k_wi, (3 * H, I), minval=-bound, maxval=bound, dtype=jnp.float32)
    w_hh = jax.random.uniform(k_wh, (3 * H, H), minval=-bound, maxval=bound, dtype=jnp.float32)
    if bias:
        b_ih = jax.random.uniform(k_bi, (3 * H,), minval=-bound, maxval=bound, dtype=jnp.float32)
        b_hh = jax.random.uniform(k_bh, (3 * H,), minval=-bound, maxval=bound, dtype=jnp.float32)
    else:
        b_ih = jnp.zeros((3 * H,), jnp.float32)
        b_hh = jnp.zeros((3 * H,), jnp.float32)

    out, h_n = gru_forward(states, hidden, w_ih, w_hh, b_ih, b_hh)
    jax.block_until_ready((out, h_n))

    ref_out, ref_hn = _gru_reference(states, hidden, w_ih, w_hh, b_ih, b_hh)
    assert out.shape == (B, T, H) and h_n.shape == (1, B, H)
    # bf16 MXU path for the recurrent matmul -> slightly looser tolerance than pure f32.
    assert jnp.allclose(out, ref_out, atol=2e-2, rtol=2e-2), (
        float(jnp.max(jnp.abs(out - ref_out))))
    assert jnp.allclose(h_n, ref_hn, atol=2e-2, rtol=2e-2), (
        float(jnp.max(jnp.abs(h_n - ref_hn))))


if __name__ == "__main__":
    key = jax.random.PRNGKey(0)
    k0, k1, k2 = jax.random.split(key, 3)

    # Primary small case (matches the module's intended shapes).
    _run_case(k0, B=2, T=8, I=16, H=32, bias=True)
    # Exercises time padding (T not a multiple of the time chunk) and batch padding.
    _run_case(k1, B=3, T=12, I=16, H=32, bias=True)
    # Exercises the batch-shard ("parallel") grid axis.
    _run_case(k2, B=16, T=8, I=16, H=32, bias=True)

    print("KERNEL_OK")
</pallas_src>

<mosaic_0001>
module attributes {stable_mosaic.version = 11 : i64} {
  func.func @_gru_kernel(%arg0: i32, %arg1: i32, %arg2: memref<8x8x384xf32, #tpu.memory_space<vmem>>, %arg3: memref<128x384xbf16, #tpu.memory_space<vmem>>, %arg4: memref<1x128xf32, #tpu.memory_space<vmem>>, %arg5: memref<8x128xf32, #tpu.memory_space<vmem>>, %arg6: memref<8x8x128xf32, #tpu.memory_space<vmem>>, %arg7: memref<8x128xf32, #tpu.memory_space<vmem>>, %arg8: memref<8x128xf32, #tpu.memory_space<vmem>>) attributes {dimension_semantics = [#tpu.dimension_semantics<parallel>, #tpu.dimension_semantics<arbitrary>], iteration_bounds = array<i64: 1, 1>, scalar_prefetch = 0 : i64, scratch_operands = 1 : i64, tpu.core_type = #tpu.core_type<tc>, window_params = [{transform_indices = @transform_0, window_bounds = array<i64: 8, 8, 384>}, {pipeline_mode = #tpu.pipeline_mode<synchronous>, transform_indices = @transform_1, window_bounds = array<i64: 128, 384>}, {pipeline_mode = #tpu.pipeline_mode<synchronous>, transform_indices = @transform_2, window_bounds = array<i64: 1, 128>}, {transform_indices = @transform_3, window_bounds = array<i64: 8, 128>}, {transform_indices = @transform_4, window_bounds = array<i64: 8, 8, 128>}, {transform_indices = @transform_5, window_bounds = array<i64: 8, 128>}]} {
    %c0_i32 = arith.constant 0 : i32
    %0 = arith.cmpi eq, %arg1, %c0_i32 : i32
    %1 = arith.extui %0 : i1 to i32
    %c0_i32_0 = arith.constant 0 : i32
    %2 = arith.cmpi ne, %1, %c0_i32_0 : i32
    scf.if %2 {
      %c0_96 = arith.constant 0 : index
      %c0_97 = arith.constant 0 : index
      %297 = vector.load %arg5[%c0_96, %c0_97] : memref<8x128xf32, #tpu.memory_space<vmem>>, vector<8x128xf32>
      %c0_98 = arith.constant 0 : index
      %c0_99 = arith.constant 0 : index
      %298 = vector.load %arg8[%c0_98, %c0_99] : memref<8x128xf32, #tpu.memory_space<vmem>>, vector<8x128xf32>
      tpu.vector_store %arg8[%c0_98, %c0_99], %297 {strides = array<i32>} : memref<8x128xf32, #tpu.memory_space<vmem>>, vector<8x128xf32>,
    } else {
    }
    %c0 = arith.constant 0 : index
    %c0_1 = arith.constant 0 : index
    %3 = vector.load %arg4[%c0, %c0_1] : memref<1x128xf32, #tpu.memory_space<vmem>>, vector<1x128xf32>
    %c0_2 = arith.constant 0 : index
    %c0_3 = arith.constant 0 : index
    %4 = vector.load %arg8[%c0_2, %c0_3] : memref<8x128xf32, #tpu.memory_space<vmem>>, vector<8x128xf32>
    %c0_4 = arith.constant 0 : index
    %c0_5 = arith.constant 0 : index
    %c0_6 = arith.constant 0 : index
    %5 = vector.load %arg2[%c0_4, %c0_5, %c0_6] : memref<8x8x384xf32, #tpu.memory_space<vmem>>, vector<1x8x384xf32>
    %6 = vector.shape_cast %5 : vector<1x8x384xf32> to vector<8x384xf32>
    %7 = arith.truncf %4 : vector<8x128xf32> to vector<8x128xbf16>
    %c0_7 = arith.constant 0 : index
    %c0_8 = arith.constant 0 : index
    %8 = vector.load %arg3[%c0_7, %c0_8] : memref<128x384xbf16, #tpu.memory_space<vmem>>, vector<128x384xbf16>
    %cst = arith.constant dense<0.000000e+00> : vector<8x384xf32>
    %9 = tpu.matmul %7, %8, %cst {dimension_numbers = #tpu.dot_dimension_numbers<[1], [0], [0], [1], [0, 0, 1, 1], [], []>} : vector<8x128xbf16>, vector<128x384xbf16>, vector<8x384xf32> -> vector<8x384xf32>
    %10 = vector.extract_strided_slice %6 {offsets = [0, 0], sizes = [8, 128], strides = [1, 1]} : vector<8x384xf32> to vector<8x128xf32>
    %11 = vector.extract_strided_slice %9 {offsets = [0, 0], sizes = [8, 128], strides = [1, 1]} : vector<8x384xf32> to vector<8x128xf32>
    %12 = arith.addf %10, %11 : vector<8x128xf32>
    %13 = arith.negf %12 : vector<8x128xf32>
    %14 = math.exp %13 : vector<8x128xf32>
    %cst_9 = arith.constant 1.000000e+00 : f32
    %15 = vector.broadcast %cst_9 : f32 to vector<8x128xf32>
    %16 = arith.addf %15, %14 : vector<8x128xf32>
    %17 = arith.divf %15, %16 : vector<8x128xf32>
    %18 = vector.extract_strided_slice %6 {offsets = [0, 128], sizes = [8, 128], strides = [1, 1]} : vector<8x384xf32> to vector<8x128xf32>
    %19 = vector.extract_strided_slice %9 {offsets = [0, 128], sizes = [8, 128], strides = [1, 1]} : vector<8x384xf32> to vector<8x128xf32>
    %20 = arith.addf %18, %19 : vector<8x128xf32>
    %21 = arith.negf %20 : vector<8x128xf32>
    %22 = math.exp %21 : vector<8x128xf32>
    %cst_10 = arith.constant 1.000000e+00 : f32
    %23 = vector.broadcast %cst_10 : f32 to vector<8x128xf32>
    %24 = arith.addf %23, %22 : vector<8x128xf32>
    %25 = arith.divf %23, %24 : vector<8x128xf32>
    %26 = vector.extract_strided_slice %6 {offsets = [0, 256], sizes = [8, 128], strides = [1, 1]} : vector<8x384xf32> to vector<8x128xf32>
    %27 = vector.extract_strided_slice %9 {offsets = [0, 256], sizes = [8, 128], strides = [1, 1]} : vector<8x384xf32> to vector<8x128xf32>
    %28 = vector.broadcast %3 : vector<1x128xf32> to vector<8x128xf32>
    %29 = arith.addf %27, %28 : vector<8x128xf32>
    %30 = arith.mulf %17, %29 : vector<8x128xf32>
    %31 = arith.addf %26, %30 : vector<8x128xf32>
    %32 = math.tanh %31 : vector<8x128xf32>
    %cst_11 = arith.constant 1.000000e+00 : f32
    %33 = vector.broadcast %cst_11 : f32 to vector<8x128xf32>
    %34 = arith.subf %33, %25 : vector<8x128xf32>
    %35 = arith.mulf %34, %32 : vector<8x128xf32>
    %36 = arith.mulf %25, %4 : vector<8x128xf32>
    %37 = arith.addf %35, %36 : vector<8x128xf32>
    %c0_12 = arith.constant 0 : index
    %c0_13 = arith.constant 0 : index
    %c0_14 = arith.constant 0 : index
    %38 = vector.load %arg6[%c0_12, %c0_13, %c0_14] : memref<8x8x128xf32, #tpu.memory_space<vmem>>, vector<1x8x128xf32>
    %39 = vector.shape_cast %38 : vector<1x8x128xf32> to vector<8x128xf32>
    %40 = vector.shape_cast %37 : vector<8x128xf32> to vector<1x8x128xf32>
    tpu.vector_store %arg6[%c0_12, %c0_13, %c0_14], %40 {strides = array<i32>} : memref<8x8x128xf32, #tpu.memory_space<vmem>>, vector<1x8x128xf32>,
    %c1 = arith.constant 1 : index
    %c0_15 = arith.constant 0 : index
    %c0_16 = arith.constant 0 : index
    %41 = vector.load %arg2[%c1, %c0_15, %c0_16] : memref<8x8x384xf32, #tpu.memory_space<vmem>>, vector<1x8x384xf32>
    %42 = vector.shape_cast %41 : vector<1x8x384xf32> to vector<8x384xf32>
    %43 = arith.truncf %37 : vector<8x128xf32> to vector<8x128xbf16>
    %c0_17 = arith.constant 0 : index
    %c0_18 = arith.constant 0 : index
    %44 = vector.load %arg3[%c0_17, %c0_18] : memref<128x384xbf16, #tpu.memory_space<vmem>>, vector<128x384xbf16>
    %cst_19 = arith.constant dense<0.000000e+00> : vector<8x384xf32>
    %45 = tpu.matmul %43, %44, %cst_19 {dimension_numbers = #tpu.dot_dimension_numbers<[1], [0], [0], [1], [0, 0, 1, 1], [], []>} : vector<8x128xbf16>, vector<128x384xbf16>, vector<8x384xf32> -> vector<8x384xf32>
    %46 = vector.extract_strided_slice %42 {offsets = [0, 0], sizes = [8, 128], strides = [1, 1]} : vector<8x384xf32> to vector<8x128xf32>
    %47 = vector.extract_strided_slice %45 {offsets = [0, 0], sizes = [8, 128], strides = [1, 1]} : vector<8x384xf32> to vector<8x128xf32>
    %48 = arith.addf %46, %47 : vector<8x128xf32>
    %49 = arith.negf %48 : vector<8x128xf32>
    %50 = math.exp %49 : vector<8x128xf32>
    %cst_20 = arith.constant 1.000000e+00 : f32
    %51 = vector.broadcast %cst_20 : f32 to vector<8x128xf32>
    %52 = arith.addf %51, %50 : vector<8x128xf32>
    %53 = arith.divf %51, %52 : vector<8x128xf32>
    %54 = vector.extract_strided_slice %42 {offsets = [0, 128], sizes = [8, 128], strides = [1, 1]} : vector<8x384xf32> to vector<8x128xf32>
    %55 = vector.extract_strided_slice %45 {offsets = [0, 128], sizes = [8, 128], strides = [1, 1]} : vector<8x384xf32> to vector<8x128xf32>
    %56 = arith.addf %54, %55 : vector<8x128xf32>
    %57 = arith.negf %56 : vector<8x128xf32>
    %58 = math.exp %57 : vector<8x128xf32>
    %cst_21 = arith.constant 1.000000e+00 : f32
    %59 = vector.broadcast %cst_21 : f32 to vector<8x128xf32>
    %60 = arith.addf %59, %58 : vector<8x128xf32>
    %61 = arith.divf %59, %60 : vector<8x128xf32>
    %62 = vector.extract_strided_slice %42 {offsets = [0, 256], sizes = [8, 128], strides = [1, 1]} : vector<8x384xf32> to vector<8x128xf32>
    %63 = vector.extract_strided_slice %45 {offsets = [0, 256], sizes = [8, 128], strides = [1, 1]} : vector<8x384xf32> to vector<8x128xf32>
    %64 = vector.broadcast %3 : vector<1x128xf32> to vector<8x128xf32>
    %65 = arith.addf %63, %64 : vector<8x128xf32>
    %66 = arith.mulf %53, %65 : vector<8x128xf32>
    %67 = arith.addf %62, %66 : vector<8x128xf32>
    %68 = math.tanh %67 : vector<8x128xf32>
    %cst_22 = arith.constant 1.000000e+00 : f32
    %69 = vector.broadcast %cst_22 : f32 to vector<8x128xf32>
    %70 = arith.subf %69, %61 : vector<8x128xf32>
    %71 = arith.mulf %70, %68 : vector<8x128xf32>
    %72 = arith.mulf %61, %37 : vector<8x128xf32>
    %73 = arith.addf %71, %72 : vector<8x128xf32>
    %c1_23 = arith.constant 1 : index
    %c0_24 = arith.constant 0 : index
    %c0_25 = arith.constant 0 : index
    %74 = vector.load %arg6[%c1_23, %c0_24, %c0_25] : memref<8x8x128xf32, #tpu.memory_space<vmem>>, vector<1x8x128xf32>
    %75 = vector.shape_cast %74 : vector<1x8x128xf32> to vector<8x128xf32>
    %76 = vector.shape_cast %73 : vector<8x128xf32> to vector<1x8x128xf32>
    tpu.vector_store %arg6[%c1_23, %c0_24, %c0_25], %76 {strides = array<i32>} : memref<8x8x128xf32, #tpu.memory_space<vmem>>, vector<1x8x128xf32>,
    %c2 = arith.constant 2 : index
    %c0_26 = arith.constant 0 : index
    %c0_27 = arith.constant 0 : index
    %77 = vector.load %arg2[%c2, %c0_26, %c0_27] : memref<8x8x384xf32, #tpu.memory_space<vmem>>, vector<1x8x384xf32>
    %78 = vector.shape_cast %77 : vector<1x8x384xf32> to vector<8x384xf32>
    %79 = arith.truncf %73 : vector<8x128xf32> to vector<8x128xbf16>
    %c0_28 = arith.constant 0 : index
    %c0_29 = arith.constant 0 : index
    %80 = vector.load %arg3[%c0_28, %c0_29] : memref<128x384xbf16, #tpu.memory_space<vmem>>, vector<128x384xbf16>
    %cst_30 = arith.constant dense<0.000000e+00> : vector<8x384xf32>
    %81 = tpu.matmul %79, %80, %cst_30 {dimension_numbers = #tpu.dot_dimension_numbers<[1], [0], [0], [1], [0, 0, 1, 1], [], []>} : vector<8x128xbf16>, vector<128x384xbf16>, vector<8x384xf32> -> vector<8x384xf32>
    %82 = vector.extract_strided_slice %78 {offsets = [0, 0], sizes = [8, 128], strides = [1, 1]} : vector<8x384xf32> to vector<8x128xf32>
    %83 = vector.extract_strided_slice %81 {offsets = [0, 0], sizes = [8, 128], strides = [1, 1]} : vector<8x384xf32> to vector<8x128xf32>
    %84 = arith.addf %82, %83 : vector<8x128xf32>
    %85 = arith.negf %84 : vector<8x128xf32>
    %86 = math.exp %85 : vector<8x128xf32>
    %cst_31 = arith.constant 1.000000e+00 : f32
    %87 = vector.broadcast %cst_31 : f32 to vector<8x128xf32>
    %88 = arith.addf %87, %86 : vector<8x128xf32>
    %89 = arith.divf %87, %88 : vector<8x128xf32>
    %90 = vector.extract_strided_slice %78 {offsets = [0, 128], sizes = [8, 128], strides = [1, 1]} : vector<8x384xf32> to vector<8x128xf32>
    %91 = vector.extract_strided_slice %81 {offsets = [0, 128], sizes = [8, 128], strides = [1, 1]} : vector<8x384xf32> to vector<8x128xf32>
    %92 = arith.addf %90, %91 : vector<8x128xf32>
    %93 = arith.negf %92 : vector<8x128xf32>
    %94 = math.exp %93 : vector<8x128xf32>
    %cst_32 = arith.constant 1.000000e+00 : f32
    %95 = vector.broadcast %cst_32 : f32 to vector<8x128xf32>
    %96 = arith.addf %95, %94 : vector<8x128xf32>
    %97 = arith.divf %95, %96 : vector<8x128xf32>
    %98 = vector.extract_strided_slice %78 {offsets = [0, 256], sizes = [8, 128], strides = [1, 1]} : vector<8x384xf32> to vector<8x128xf32>
    %99 = vector.extract_strided_slice %81 {offsets = [0, 256], sizes = [8, 128], strides = [1, 1]} : vector<8x384xf32> to vector<8x128xf32>
    %100 = vector.broadcast %3 : vector<1x128xf32> to vector<8x128xf32>
    %101 = arith.addf %99, %100 : vector<8x128xf32>
    %102 = arith.mulf %89, %101 : vector<8x128xf32>
    %103 = arith.addf %98, %102 : vector<8x128xf32>
    %104 = math.tanh %103 : vector<8x128xf32>
    %cst_33 = arith.constant 1.000000e+00 : f32
    %105 = vector.broadcast %cst_33 : f32 to vector<8x128xf32>
    %106 = arith.subf %105, %97 : vector<8x128xf32>
    %107 = arith.mulf %106, %104 : vector<8x128xf32>
    %108 = arith.mulf %97, %73 : vector<8x128xf32>
    %109 = arith.addf %107, %108 : vector<8x128xf32>
    %c2_34 = arith.constant 2 : index
    %c0_35 = arith.constant 0 : index
    %c0_36 = arith.constant 0 : index
    %110 = vector.load %arg6[%c2_34, %c0_35, %c0_36] : memref<8x8x128xf32, #tpu.memory_space<vmem>>, vector<1x8x128xf32>
    %111 = vector.shape_cast %110 : vector<1x8x128xf32> to vector<8x128xf32>
    %112 = vector.shape_cast %109 : vector<8x128xf32> to vector<1x8x128xf32>
    tpu.vector_store %arg6[%c2_34, %c0_35, %c0_36], %112 {strides = array<i32>} : memref<8x8x128xf32, #tpu.memory_space<vmem>>, vector<1x8x128xf32>,
    %c3 = arith.constant 3 : index
    %c0_37 = arith.constant 0 : index
    %c0_38 = arith.constant 0 : index
    %113 = vector.load %arg2[%c3, %c0_37, %c0_38] : memref<8x8x384xf32, #tpu.memory_space<vmem>>, vector<1x8x384xf32>
    %114 = vector.shape_cast %113 : vector<1x8x384xf32> to vector<8x384xf32>
    %115 = arith.truncf %109 : vector<8x128xf32> to vector<8x128xbf16>
    %c0_39 = arith.constant 0 : index
    %c0_40 = arith.constant 0 : index
    %116 = vector.load %arg3[%c0_39, %c0_40] : memref<128x384xbf16, #tpu.memory_space<vmem>>, vector<128x384xbf16>
    %cst_41 = arith.constant dense<0.000000e+00> : vector<8x384xf32>
    %117 = tpu.matmul %115, %116, %cst_41 {dimension_numbers = #tpu.dot_dimension_numbers<[1], [0], [0], [1], [0, 0, 1, 1], [], []>} : vector<8x128xbf16>, vector<128x384xbf16>, vector<8x384xf32> -> vector<8x384xf32>
    %118 = vector.extract_strided_slice %114 {offsets = [0, 0], sizes = [8, 128], strides = [1, 1]} : vector<8x384xf32> to vector<8x128xf32>
    %119 = vector.extract_strided_slice %117 {offsets = [0, 0], sizes = [8, 128], strides = [1, 1]} : vector<8x384xf32> to vector<8x128xf32>
    %120 = arith.addf %118, %119 : vector<8x128xf32>
    %121 = arith.negf %120 : vector<8x128xf32>
    %122 = math.exp %121 : vector<8x128xf32>
    %cst_42 = arith.constant 1.000000e+00 : f32
    %123 = vector.broadcast %cst_42 : f32 to vector<8x128xf32>
    %124 = arith.addf %123, %122 : vector<8x128xf32>
    %125 = arith.divf %123, %124 : vector<8x128xf32>
    %126 = vector.extract_strided_slice %114 {offsets = [0, 128], sizes = [8, 128], strides = [1, 1]} : vector<8x384xf32> to vector<8x128xf32>
    %127 = vector.extract_strided_slice %117 {offsets = [0, 128], sizes = [8, 128], strides = [1, 1]} : vector<8x384xf32> to vector<8x128xf32>
    %128 = arith.addf %126, %127 : vector<8x128xf32>
    %129 = arith.negf %128 : vector<8x128xf32>
    %130 = math.exp %129 : vector<8x128xf32>
    %cst_43 = arith.constant 1.000000e+00 : f32
    %131 = vector.broadcast %cst_43 : f32 to vector<8x128xf32>
    %132 = arith.addf %131, %130 : vector<8x128xf32>
    %133 = arith.divf %131, %132 : vector<8x128xf32>
    %134 = vector.extract_strided_slice %114 {offsets = [0, 256], sizes = [8, 128], strides = [1, 1]} : vector<8x384xf32> to vector<8x128xf32>
    %135 = vector.extract_strided_slice %117 {offsets = [0, 256], sizes = [8, 128], strides = [1, 1]} : vector<8x384xf32> to vector<8x128xf32>
    %136 = vector.broadcast %3 : vector<1x128xf32> to vector<8x128xf32>
    %137 = arith.addf %135, %136 : vector<8x128xf32>
    %138 = arith.mulf %125, %137 : vector<8x128xf32>
    %139 = arith.addf %134, %138 : vector<8x128xf32>
    %140 = math.tanh %139 : vector<8x128xf32>
    %cst_44 = arith.constant 1.000000e+00 : f32
    %141 = vector.broadcast %cst_44 : f32 to vector<8x128xf32>
    %142 = arith.subf %141, %133 : vector<8x128xf32>
    %143 = arith.mulf %142, %140 : vector<8x128xf32>
    %144 = arith.mulf %133, %109 : vector<8x128xf32>
    %145 = arith.addf %143, %144 : vector<8x128xf32>
    %c3_45 = arith.constant 3 : index
    %c0_46 = arith.constant 0 : index
    %c0_47 = arith.constant 0 : index
    %146 = vector.load %arg6[%c3_45, %c0_46, %c0_47] : memref<8x8x128xf32, #tpu.memory_space<vmem>>, vector<1x8x128xf32>
    %147 = vector.shape_cast %146 : vector<1x8x128xf32> to vector<8x128xf32>
    %148 = vector.shape_cast %145 : vector<8x128xf32> to vector<1x8x128xf32>
    tpu.vector_store %arg6[%c3_45, %c0_46, %c0_47], %148 {strides = array<i32>} : memref<8x8x128xf32, #tpu.memory_space<vmem>>, vector<1x8x128xf32>,
    %c4 = arith.constant 4 : index
    %c0_48 = arith.constant 0 : index
    %c0_49 = arith.constant 0 : index
    %149 = vector.load %arg2[%c4, %c0_48, %c0_49] : memref<8x8x384xf32, #tpu.memory_space<vmem>>, vector<1x8x384xf32>
    %150 = vector.shape_cast %149 : vector<1x8x384xf32> to vector<8x384xf32>
    %151 = arith.truncf %145 : vector<8x128xf32> to vector<8x128xbf16>
    %c0_50 = arith.constant 0 : index
    %c0_51 = arith.constant 0 : index
    %152 = vector.load %arg3[%c0_50, %c0_51] : memref<128x384xbf16, #tpu.memory_space<vmem>>, vector<128x384xbf16>
    %cst_52 = arith.constant dense<0.000000e+00> : vector<8x384xf32>
    %153 = tpu.matmul %151, %152, %cst_52 {dimension_numbers = #tpu.dot_dimension_numbers<[1], [0], [0], [1], [0, 0, 1, 1], [], []>} : vector<8x128xbf16>, vector<128x384xbf16>, vector<8x384xf32> -> vector<8x384xf32>
    %154 = vector.extract_strided_slice %150 {offsets = [0, 0], sizes = [8, 128], strides = [1, 1]} : vector<8x384xf32> to vector<8x128xf32>
    %155 = vector.extract_strided_slice %153 {offsets = [0, 0], sizes = [8, 128], strides = [1, 1]} : vector<8x384xf32> to vector<8x128xf32>
    %156 = arith.addf %154, %155 : vector<8x128xf32>
    %157 = arith.negf %156 : vector<8x128xf32>
    %158 = math.exp %157 : vector<8x128xf32>
    %cst_53 = arith.constant 1.000000e+00 : f32
    %159 = vector.broadcast %cst_53 : f32 to vector<8x128xf32>
    %160 = arith.addf %159, %158 : vector<8x128xf32>
    %161 = arith.divf %159, %160 : vector<8x128xf32>
    %162 = vector.extract_strided_slice %150 {offsets = [0, 128], sizes = [8, 128], strides = [1, 1]} : vector<8x384xf32> to vector<8x128xf32>
    %163 = vector.extract_strided_slice %153 {offsets = [0, 128], sizes = [8, 128], strides = [1, 1]} : vector<8x384xf32> to vector<8x128xf32>
    %164 = arith.addf %162, %163 : vector<8x128xf32>
    %165 = arith.negf %164 : vector<8x128xf32>
    %166 = math.exp %165 : vector<8x128xf32>
    %cst_54 = arith.constant 1.000000e+00 : f32
    %167 = vector.broadcast %cst_54 : f32 to vector<8x128xf32>
    %168 = arith.addf %167, %166 : vector<8x128xf32>
    %169 = arith.divf %167, %168 : vector<8x128xf32>
    %170 = vector.extract_strided_slice %150 {offsets = [0, 256], sizes = [8, 128], strides = [1, 1]} : vector<8x384xf32> to vector<8x128xf32>
    %171 = vector.extract_strided_slice %153 {offsets = [0, 256], sizes = [8, 128], strides = [1, 1]} : vector<8x384xf32> to vector<8x128xf32>
    %172 = vector.broadcast %3 : vector<1x128xf32> to vector<8x128xf32>
    %173 = arith.addf %171, %172 : vector<8x128xf32>
    %174 = arith.mulf %161, %173 : vector<8x128xf32>
    %175 = arith.addf %170, %174 : vector<8x128xf32>
    %176 = math.tanh %175 : vector<8x128xf32>
    %cst_55 = arith.constant 1.000000e+00 : f32
    %177 = vector.broadcast %cst_55 : f32 to vector<8x128xf32>
    %178 = arith.subf %177, %169 : vector<8x128xf32>
    %179 = arith.mulf %178, %176 : vector<8x128xf32>
    %180 = arith.mulf %169, %145 : vector<8x128xf32>
    %181 = arith.addf %179, %180 : vector<8x128xf32>
    %c4_56 = arith.constant 4 : index
    %c0_57 = arith.constant 0 : index
    %c0_58 = arith.constant 0 : index
    %182 = vector.load %arg6[%c4_56, %c0_57, %c0_58] : memref<8x8x128xf32, #tpu.memory_space<vmem>>, vector<1x8x128xf32>
    %183 = vector.shape_cast %182 : vector<1x8x128xf32> to vector<8x128xf32>
    %184 = vector.shape_cast %181 : vector<8x128xf32> to vector<1x8x128xf32>
    tpu.vector_store %arg6[%c4_56, %c0_57, %c0_58], %184 {strides = array<i32>} : memref<8x8x128xf32, #tpu.memory_space<vmem>>, vector<1x8x128xf32>,
    %c5 = arith.constant 5 : index
    %c0_59 = arith.constant 0 : index
    %c0_60 = arith.constant 0 : index
    %185 = vector.load %arg2[%c5, %c0_59, %c0_60] : memref<8x8x384xf32, #tpu.memory_space<vmem>>, vector<1x8x384xf32>
    %186 = vector.shape_cast %185 : vector<1x8x384xf32> to vector<8x384xf32>
    %187 = arith.truncf %181 : vector<8x128xf32> to vector<8x128xbf16>
    %c0_61 = arith.constant 0 : index
    %c0_62 = arith.constant 0 : index
    %188 = vector.load %arg3[%c0_61, %c0_62] : memref<128x384xbf16, #tpu.memory_space<vmem>>, vector<128x384xbf16>
    %cst_63 = arith.constant dense<0.000000e+00> : vector<8x384xf32>
    %189 = tpu.matmul %187, %188, %cst_63 {dimension_numbers = #tpu.dot_dimension_numbers<[1], [0], [0], [1], [0, 0, 1, 1], [], []>} : vector<8x128xbf16>, vector<128x384xbf16>, vector<8x384xf32> -> vector<8x384xf32>
    %190 = vector.extract_strided_slice %186 {offsets = [0, 0], sizes = [8, 128], strides = [1, 1]} : vector<8x384xf32> to vector<8x128xf32>
    %191 = vector.extract_strided_slice %189 {offsets = [0, 0], sizes = [8, 128], strides = [1, 1]} : vector<8x384xf32> to vector<8x128xf32>
    %192 = arith.addf %190, %191 : vector<8x128xf32>
    %193 = arith.negf %192 : vector<8x128xf32>
    %194 = math.exp %193 : vector<8x128xf32>
    %cst_64 = arith.constant 1.000000e+00 : f32
    %195 = vector.broadcast %cst_64 : f32 to vector<8x128xf32>
    %196 = arith.addf %195, %194 : vector<8x128xf32>
    %197 = arith.divf %195, %196 : vector<8x128xf32>
    %198 = vector.extract_strided_slice %186 {offsets = [0, 128], sizes = [8, 128], strides = [1, 1]} : vector<8x384xf32> to vector<8x128xf32>
    %199 = vector.extract_strided_slice %189 {offsets = [0, 128], sizes = [8, 128], strides = [1, 1]} : vector<8x384xf32> to vector<8x128xf32>
    %200 = arith.addf %198, %199 : vector<8x128xf32>
    %201 = arith.negf %200 : vector<8x128xf32>
    %202 = math.exp %201 : vector<8x128xf32>
    %cst_65 = arith.constant 1.000000e+00 : f32
    %203 = vector.broadcast %cst_65 : f32 to vector<8x128xf32>
    %204 = arith.addf %203, %202 : vector<8x128xf32>
    %205 = arith.divf %203, %204 : vector<8x128xf32>
    %206 = vector.extract_strided_slice %186 {offsets = [0, 256], sizes = [8, 128], strides = [1, 1]} : vector<8x384xf32> to vector<8x128xf32>
    %207 = vector.extract_strided_slice %189 {offsets = [0, 256], sizes = [8, 128], strides = [1, 1]} : vector<8x384xf32> to vector<8x128xf32>
    %208 = vector.broadcast %3 : vector<1x128xf32> to vector<8x128xf32>
    %209 = arith.addf %207, %208 : vector<8x128xf32>
    %210 = arith.mulf %197, %209 : vector<8x128xf32>
    %211 = arith.addf %206, %210 : vector<8x128xf32>
    %212 = math.tanh %211 : vector<8x128xf32>
    %cst_66 = arith.constant 1.000000e+00 : f32
    %213 = vector.broadcast %cst_66 : f32 to vector<8x128xf32>
    %214 = arith.subf %213, %205 : vector<8x128xf32>
    %215 = arith.mulf %214, %212 : vector<8x128xf32>
    %216 = arith.mulf %205, %181 : vector<8x128xf32>
    %217 = arith.addf %215, %216 : vector<8x128xf32>
    %c5_67 = arith.constant 5 : index
    %c0_68 = arith.constant 0 : index
    %c0_69 = arith.constant 0 : index
    %218 = vector.load %arg6[%c5_67, %c0_68, %c0_69] : memref<8x8x128xf32, #tpu.memory_space<vmem>>, vector<1x8x128xf32>
    %219 = vector.shape_cast %218 : vector<1x8x128xf32> to vector<8x128xf32>
    %220 = vector.shape_cast %217 : vector<8x128xf32> to vector<1x8x128xf32>
    tpu.vector_store %arg6[%c5_67, %c0_68, %c0_69], %220 {strides = array<i32>} : memref<8x8x128xf32, #tpu.memory_space<vmem>>, vector<1x8x128xf32>,
    %c6 = arith.constant 6 : index
    %c0_70 = arith.constant 0 : index
    %c0_71 = arith.constant 0 : index
    %221 = vector.load %arg2[%c6, %c0_70, %c0_71] : memref<8x8x384xf32, #tpu.memory_space<vmem>>, vector<1x8x384xf32>
    %222 = vector.shape_cast %221 : vector<1x8x384xf32> to vector<8x384xf32>
    %223 = arith.truncf %217 : vector<8x128xf32> to vector<8x128xbf16>
    %c0_72 = arith.constant 0 : index
    %c0_73 = arith.constant 0 : index
    %224 = vector.load %arg3[%c0_72, %c0_73] : memref<128x384xbf16, #tpu.memory_space<vmem>>, vector<128x384xbf16>
    %cst_74 = arith.constant dense<0.000000e+00> : vector<8x384xf32>
    %225 = tpu.matmul %223, %224, %cst_74 {dimension_numbers = #tpu.dot_dimension_numbers<[1], [0], [0], [1], [0, 0, 1, 1], [], []>} : vector<8x128xbf16>, vector<128x384xbf16>, vector<8x384xf32> -> vector<8x384xf32>
    %226 = vector.extract_strided_slice %222 {offsets = [0, 0], sizes = [8, 128], strides = [1, 1]} : vector<8x384xf32> to vector<8x128xf32>
    %227 = vector.extract_strided_slice %225 {offsets = [0, 0], sizes = [8, 128], strides = [1, 1]} : vector<8x384xf32> to vector<8x128xf32>
    %228 = arith.addf %226, %227 : vector<8x128xf32>
    %229 = arith.negf %228 : vector<8x128xf32>
    %230 = math.exp %229 : vector<8x128xf32>
    %cst_75 = arith.constant 1.000000e+00 : f32
    %231 = vector.broadcast %cst_75 : f32 to vector<8x128xf32>
    %232 = arith.addf %231, %230 : vector<8x128xf32>
    %233 = arith.divf %231, %232 : vector<8x128xf32>
    %234 = vector.extract_strided_slice %222 {offsets = [0, 128], sizes = [8, 128], strides = [1, 1]} : vector<8x384xf32> to vector<8x128xf32>
    %235 = vector.extract_strided_slice %225 {offsets = [0, 128], sizes = [8, 128], strides = [1, 1]} : vector<8x384xf32> to vector<8x128xf32>
    %236 = arith.addf %234, %235 : vector<8x128xf32>
    %237 = arith.negf %236 : vector<8x128xf32>
    %238 = math.exp %237 : vector<8x128xf32>
    %cst_76 = arith.constant 1.000000e+00 : f32
    %239 = vector.broadcast %cst_76 : f32 to vector<8x128xf32>
    %240 = arith.addf %239, %238 : vector<8x128xf32>
    %241 = arith.divf %239, %240 : vector<8x128xf32>
    %242 = vector.extract_strided_slice %222 {offsets = [0, 256], sizes = [8, 128], strides = [1, 1]} : vector<8x384xf32> to vector<8x128xf32>
    %243 = vector.extract_strided_slice %225 {offsets = [0, 256], sizes = [8, 128], strides = [1, 1]} : vector<8x384xf32> to vector<8x128xf32>
    %244 = vector.broadcast %3 : vector<1x128xf32> to vector<8x128xf32>
    %245 = arith.addf %243, %244 : vector<8x128xf32>
    %246 = arith.mulf %233, %245 : vector<8x128xf32>
    %247 = arith.addf %242, %246 : vector<8x128xf32>
    %248 = math.tanh %247 : vector<8x128xf32>
    %cst_77 = arith.constant 1.000000e+00 : f32
    %249 = vector.broadcast %cst_77 : f32 to vector<8x128xf32>
    %250 = arith.subf %249, %241 : vector<8x128xf32>
    %251 = arith.mulf %250, %248 : vector<8x128xf32>
    %252 = arith.mulf %241, %217 : vector<8x128xf32>
    %253 = arith.addf %251, %252 : vector<8x128xf32>
    %c6_78 = arith.constant 6 : index
    %c0_79 = arith.constant 0 : index
    %c0_80 = arith.constant 0 : index
    %254 = vector.load %arg6[%c6_78, %c0_79, %c0_80] : memref<8x8x128xf32, #tpu.memory_space<vmem>>, vector<1x8x128xf32>
    %255 = vector.shape_cast %254 : vector<1x8x128xf32> to vector<8x128xf32>
    %256 = vector.shape_cast %253 : vector<8x128xf32> to vector<1x8x128xf32>
    tpu.vector_store %arg6[%c6_78, %c0_79, %c0_80], %256 {strides = array<i32>} : memref<8x8x128xf32, #tpu.memory_space<vmem>>, vector<1x8x128xf32>,
    %c7 = arith.constant 7 : index
    %c0_81 = arith.constant 0 : index
    %c0_82 = arith.constant 0 : index
    %257 = vector.load %arg2[%c7, %c0_81, %c0_82] : memref<8x8x384xf32, #tpu.memory_space<vmem>>, vector<1x8x384xf32>
    %258 = vector.shape_cast %257 : vector<1x8x384xf32> to vector<8x384xf32>
    %259 = arith.truncf %253 : vector<8x128xf32> to vector<8x128xbf16>
    %c0_83 = arith.constant 0 : index
    %c0_84 = arith.constant 0 : index
    %260 = vector.load %arg3[%c0_83, %c0_84] : memref<128x384xbf16, #tpu.memory_space<vmem>>, vector<128x384xbf16>
    %cst_85 = arith.constant dense<0.000000e+00> : vector<8x384xf32>
    %261 = tpu.matmul %259, %260, %cst_85 {dimension_numbers = #tpu.dot_dimension_numbers<[1], [0], [0], [1], [0, 0, 1, 1], [], []>} : vector<8x128xbf16>, vector<128x384xbf16>, vector<8x384xf32> -> vector<8x384xf32>
    %262 = vector.extract_strided_slice %258 {offsets = [0, 0], sizes = [8, 128], strides = [1, 1]} : vector<8x384xf32> to vector<8x128xf32>
    %263 = vector.extract_strided_slice %261 {offsets = [0, 0], sizes = [8, 128], strides = [1, 1]} : vector<8x384xf32> to vector<8x128xf32>
    %264 = arith.addf %262, %263 : vector<8x128xf32>
    %265 = arith.negf %264 : vector<8x128xf32>
    %266 = math.exp %265 : vector<8x128xf32>
    %cst_86 = arith.constant 1.000000e+00 : f32
    %267 = vector.broadcast %cst_86 : f32 to vector<8x128xf32>
    %268 = arith.addf %267, %266 : vector<8x128xf32>
    %269 = arith.divf %267, %268 : vector<8x128xf32>
    %270 = vector.extract_strided_slice %258 {offsets = [0, 128], sizes = [8, 128], strides = [1, 1]} : vector<8x384xf32> to vector<8x128xf32>
    %271 = vector.extract_strided_slice %261 {offsets = [0, 128], sizes = [8, 128], strides = [1, 1]} : vector<8x384xf32> to vector<8x128xf32>
    %272 = arith.addf %270, %271 : vector<8x128xf32>
    %273 = arith.negf %272 : vector<8x128xf32>
    %274 = math.exp %273 : vector<8x128xf32>
    %cst_87 = arith.constant 1.000000e+00 : f32
    %275 = vector.broadcast %cst_87 : f32 to vector<8x128xf32>
    %276 = arith.addf %275, %274 : vector<8x128xf32>
    %277 = arith.divf %275, %276 : vector<8x128xf32>
    %278 = vector.extract_strided_slice %258 {offsets = [0, 256], sizes = [8, 128], strides = [1, 1]} : vector<8x384xf32> to vector<8x128xf32>
    %279 = vector.extract_strided_slice %261 {offsets = [0, 256], sizes = [8, 128], strides = [1, 1]} : vector<8x384xf32> to vector<8x128xf32>
    %280 = vector.broadcast %3 : vector<1x128xf32> to vector<8x128xf32>
    %281 = arith.addf %279, %280 : vector<8x128xf32>
    %282 = arith.mulf %269, %281 : vector<8x128xf32>
    %283 = arith.addf %278, %282 : vector<8x128xf32>
    %284 = math.tanh %283 : vector<8x128xf32>
    %cst_88 = arith.constant 1.000000e+00 : f32
    %285 = vector.broadcast %cst_88 : f32 to vector<8x128xf32>
    %286 = arith.subf %285, %277 : vector<8x128xf32>
    %287 = arith.mulf %286, %284 : vector<8x128xf32>
    %288 = arith.mulf %277, %253 : vector<8x128xf32>
    %289 = arith.addf %287, %288 : vector<8x128xf32>
    %c7_89 = arith.constant 7 : index
    %c0_90 = arith.constant 0 : index
    %c0_91 = arith.constant 0 : index
    %290 = vector.load %arg6[%c7_89, %c0_90, %c0_91] : memref<8x8x128xf32, #tpu.memory_space<vmem>>, vector<1x8x128xf32>
    %291 = vector.shape_cast %290 : vector<1x8x128xf32> to vector<8x128xf32>
    %292 = vector.shape_cast %289 : vector<8x128xf32> to vector<1x8x128xf32>
    tpu.vector_store %arg6[%c7_89, %c0_90, %c0_91], %292 {strides = array<i32>} : memref<8x8x128xf32, #tpu.memory_space<vmem>>, vector<1x8x128xf32>,
    %c0_92 = arith.constant 0 : index
    %c0_93 = arith.constant 0 : index
    %293 = vector.load %arg8[%c0_92, %c0_93] : memref<8x128xf32, #tpu.memory_space<vmem>>, vector<8x128xf32>
    tpu.vector_store %arg8[%c0_92, %c0_93], %289 {strides = array<i32>} : memref<8x128xf32, #tpu.memory_space<vmem>>, vector<8x128xf32>,
    %c0_i32_94 = arith.constant 0 : i32
    %294 = arith.cmpi eq, %arg1, %c0_i32_94 : i32
    %295 = arith.extui %294 : i1 to i32
    %c0_i32_95 = arith.constant 0 : i32
    %296 = arith.cmpi ne, %295, %c0_i32_95 : i32
    scf.if %296 {
      %c0_96 = arith.constant 0 : index
      %c0_97 = arith.constant 0 : index
      %297 = vector.load %arg7[%c0_96, %c0_97] : memref<8x128xf32, #tpu.memory_space<vmem>>, vector<8x128xf32>
      tpu.vector_store %arg7[%c0_96, %c0_97], %289 {strides = array<i32>} : memref<8x128xf32, #tpu.memory_space<vmem>>, vector<8x128xf32>,
    } else {
    }
    return
  }
  func.func @transform_0(%arg0: i32, %arg1: i32) -> (i32, i32, i32) {
    %c0_i32 = arith.constant 0 : i32
    %c0_i32_0 = arith.constant 0 : i32
    return %arg1, %arg0, %c0_i32 : i32, i32, i32
  }
  func.func @transform_1(%arg0: i32, %arg1: i32) -> (i32, i32) {
    %c0_i32 = arith.constant 0 : i32
    %c0_i32_0 = arith.constant 0 : i32
    %c0_i32_1 = arith.constant 0 : i32
    return %c0_i32, %c0_i32_0 : i32, i32
  }
  func.func @transform_2(%arg0: i32, %arg1: i32) -> (i32, i32) {
    %c0_i32 = arith.constant 0 : i32
    %c0_i32_0 = arith.constant 0 : i32
    %c0_i32_1 = arith.constant 0 : i32
    return %c0_i32, %c0_i32_0 : i32, i32
  }
  func.func @transform_3(%arg0: i32, %arg1: i32) -> (i32, i32) {
    %c0_i32 = arith.constant 0 : i32
    %c0_i32_0 = arith.constant 0 : i32
    return %arg0, %c0_i32 : i32, i32
  }
  func.func @transform_4(%arg0: i32, %arg1: i32) -> (i32, i32, i32) {
    %c0_i32 = arith.constant 0 : i32
    %c0_i32_0 = arith.constant 0 : i32
    return %arg1, %arg0, %c0_i32 : i32, i32, i32
  }
  func.func @transform_5(%arg0: i32, %arg1: i32) -> (i32, i32) {
    %c0_i32 = arith.constant 0 : i32
    %c0_i32_0 = arith.constant 0 : i32
    return %arg0, %c0_i32 : i32, i32
  }
}

</mosaic_0001>

<bundles_post_ra>
// kernel: gru_forward.1
= control target key start
LH: loop header
LB: loop body
LE: loop exit
PB: predicated region body
PF: predicated region fallthrough
CT: control target
= control target key end

     0   :  { %s4514_s1 = inlined_call_operand.vmem [shape: bf16[128,384], index: 1, kind: input, shape index: {}]   ;;  %s4515_s3 = inlined_call_operand.vmem [shape: f32[8,128], index: 3, kind: input, shape index: {}]   ;;  %s4516_s2 = inlined_call_operand.vmem [shape: f32[1,128], index: 2, kind: input, shape index: {}]   ;;  %s4517_s0 = inlined_call_operand.vmem [shape: f32[8,8,384], index: 0, kind: input, shape index: {}]   ;;  %s4518_s4 = inlined_call_operand.vmem [shape: f32[8,8,128], index: 4, kind: output, shape index: {0}]   ;;  %s4519_s5 = inlined_call_operand.vmem [shape: f32[8,128], index: 5, kind: output, shape index: {1}]  }
   0x1   :  { %v2159_v0 = vld [vmem:[%s4514_s1 + $0xa8] sm:$0xf]  ;;  %v2907_v1 = vld [vmem:[%s4514_s1 + $0xb0] sm:$0xf0]  ;;  %v2906_v2 = vld [vmem:[%s4514_s1 + $0xac] sm:$0xf] }
   0x2   :  { %v2160_v3 = vor.u32 %v2907_v1, %v2159_v0  ;;  %v2161_v4 = vld [vmem:[%s4514_s1 + $0xb4] sm:$0xf0]  ;;  %v2147_v5 = vld [vmem:[%s4514_s1 + $0x90] sm:$0xf]  ;;  %v2904_v6 = vld [vmem:[%s4514_s1 + $0x98] sm:$0xf0] }
   0x3   :  { %v2164_v7 = vor.u32 %v2906_v2, %v2161_v4  ;;  %v2903_v8 = vld [vmem:[%s4514_s1 + $0x94] sm:$0xf]  ;;  %v2149_v9 = vld [vmem:[%s4514_s1 + $0x9c] sm:$0xf0]  ;;  %v2148_v10 = vor.u32 %v2904_v6, %v2147_v5  ;;  %v2135_v12 = vld [vmem:[%s4514_s1 + $0x78] sm:$0xf] }
   0x4   :  { %191 = vmatpush.bf16.msra.mxu0 %v2160_v3  ;;  %v2152_v11 = vor.u32 %v2903_v8, %v2149_v9  ;;  %v2901_v13 = vld [vmem:[%s4514_s1 + $0x80] sm:$0xf0]  ;;  %v2900_v14 = vld [vmem:[%s4514_s1 + $0x7c] sm:$0xf]  ;;  %v2137_v15 = vld [vmem:[%s4514_s1 + $0x84] sm:$0xf0] }
   0x5   :  { %204 = vmatpush.bf16.msra.mxu1 %v2164_v7  ;;  %v2167_v16 = vld [vmem:[%s4514_s1 + $0xb0] sm:$0xf]  ;;  %v2908_v17 = vld [vmem:[%s4514_s1 + $0xb8] sm:$0xf0]  ;;  %v2136_v19 = vor.u32 %v2901_v13, %v2135_v12  ;;  %v2155_v20 = vld [vmem:[%s4514_s1 + $0x98] sm:$0xf]  ;;  %v2140_v22 = vor.u32 %v2900_v14, %v2137_v15 }
   0x6   :  { %v2168_v18 = vor.u32 %v2908_v17, %v2167_v16  ;;  %v2905_v21 = vld [vmem:[%s4514_s1 + $0xa0] sm:$0xf0]  ;;  %v2123_v23 = vld [vmem:[%s4514_s1 + $0x60] sm:$0xf]  ;;  %v2898_v24 = vld [vmem:[%s4514_s1 + $0x68] sm:$0xf0] }
   0x7   :  { %v2897_v25 = vld [vmem:[%s4514_s1 + $0x64] sm:$0xf]  ;;  %v2156_v26 = vor.u32 %v2905_v21, %v2155_v20  ;;  %v2125_v27 = vld [vmem:[%s4514_s1 + $0x6c] sm:$0xf0]  ;;  %v2143_v28 = vld [vmem:[%s4514_s1 + $0x80] sm:$0xf]  ;;  %v2124_v30 = vor.u32 %v2898_v24, %v2123_v23 }
   0x8   :  { %192 = vmatpush.bf16.msra.mxu0 %v2148_v10  ;;  %217 = vmatpush.bf16.msra.mxu2 %v2168_v18  ;;  %v2902_v29 = vld [vmem:[%s4514_s1 + $0x88] sm:$0xf0]  ;;  %v2128_v31 = vor.u32 %v2897_v25, %v2125_v27  ;;  %v2111_v32 = vld [vmem:[%s4514_s1 + $0x48] sm:$0xf]  ;;  %v2895_v33 = vld [vmem:[%s4514_s1 + $0x50] sm:$0xf0] }
   0x9   :  { %205 = vmatpush.bf16.msra.mxu1 %v2152_v11  ;;  %v2894_v34 = vld [vmem:[%s4514_s1 + $0x4c] sm:$0xf]  ;;  %v2144_v35 = vor.u32 %v2902_v29, %v2143_v28  ;;  %v2113_v36 = vld [vmem:[%s4514_s1 + $0x54] sm:$0xf0]  ;;  %v2131_v37 = vld [vmem:[%s4514_s1 + $0x68] sm:$0xf]  ;;  %v2112_v39 = vor.u32 %v2895_v33, %v2111_v32 }
   0xa   :  { %v2899_v38 = vld [vmem:[%s4514_s1 + $0x70] sm:$0xf0]  ;;  %v2116_v40 = vor.u32 %v2894_v34, %v2113_v36  ;;  %v2099_v41 = vld [vmem:[%s4514_s1 + $0x30] sm:$0xf]  ;;  %v2892_v42 = vld [vmem:[%s4514_s1 + $0x38] sm:$0xf0] }
   0xb   :  { %v2891_v43 = vld [vmem:[%s4514_s1 + $0x34] sm:$0xf]  ;;  %v2132_v44 = vor.u32 %v2899_v38, %v2131_v37  ;;  %v2101_v45 = vld [vmem:[%s4514_s1 + $0x3c] sm:$0xf0]  ;;  %v2119_v46 = vld [vmem:[%s4514_s1 + $0x50] sm:$0xf]  ;;  %v2100_v48 = vor.u32 %v2892_v42, %v2099_v41 }
   0xc   :  { %193 = vmatpush.bf16.msra.mxu0 %v2136_v19  ;;  %218 = vmatpush.bf16.msra.mxu2 %v2156_v26  ;;  %v2896_v47 = vld [vmem:[%s4514_s1 + $0x58] sm:$0xf0]  ;;  %v2104_v49 = vor.u32 %v2891_v43, %v2101_v45  ;;  %v2087_v50 = vld [vmem:[%s4514_s1 + $0x18] sm:$0xf]  ;;  %v2889_v51 = vld [vmem:[%s4514_s1 + $0x20] sm:$0xf0] }
   0xd   :  { %206 = vmatpush.bf16.msra.mxu1 %v2140_v22  ;;  %v2888_v52 = vld [vmem:[%s4514_s1 + $0x1c] sm:$0xf]  ;;  %v2120_v53 = vor.u32 %v2896_v47, %v2119_v46  ;;  %v2089_v54 = vld [vmem:[%s4514_s1 + $0x24] sm:$0xf0]  ;;  %v2107_v55 = vld [vmem:[%s4514_s1 + $0x38] sm:$0xf]  ;;  %v2088_v57 = vor.u32 %v2889_v51, %v2087_v50 }
   0xe   :  { %v2893_v56 = vld [vmem:[%s4514_s1 + $0x40] sm:$0xf0]  ;;  %v2092_v58 = vor.u32 %v2888_v52, %v2089_v54  ;;  %v2075_v59 = vld [vmem:[%s4514_s1] sm:$0xf]  ;;  %v2886_v60 = vld [vmem:[%s4514_s1 + $0x8] sm:$0xf0] }
   0xf   :  { %v2885_v61 = vld [vmem:[%s4514_s1 + $0x4] sm:$0xf]  ;;  %v2108_v62 = vor.u32 %v2893_v56, %v2107_v55  ;;  %v2077_v63 = vld [vmem:[%s4514_s1 + $0xc] sm:$0xf0]  ;;  %v2095_v0 = vld [vmem:[%s4514_s1 + $0x20] sm:$0xf]  ;;  %v2076_v2 = vor.u32 %v2886_v60, %v2075_v59 }
  0x10   :  { %194 = vmatpush.bf16.msra.mxu0 %v2124_v30  ;;  %219 = vmatpush.bf16.msra.mxu2 %v2144_v35  ;;  %v2890_v1 = vld [vmem:[%s4514_s1 + $0x28] sm:$0xf0]  ;;  %v3330_v3 = vld [vmem:[%s4515_s3] sm:$0xff]  ;;  %v2080_v4 = vor.u32 %v2885_v61, %v2077_v63  ;;  %v2083_v6 = vld [vmem:[%s4514_s1 + $0x8] sm:$0xf] }
  0x11   :  { %207 = vmatpush.bf16.msra.mxu1 %v2128_v31  ;;  %v2096_v5 = vor.u32 %v2890_v1, %v2095_v0  ;;  %v2887_v7 = vld [vmem:[%s4514_s1 + $0x10] sm:$0xf0]  ;;  %v30_v8 = vpack.c.bf16 %v3330_v3, %v3330_v3  ;;  %v2260_v10 = vld [vmem:[%s4514_s1 + $0xa8] sm:$0xf]  ;;  %v2930_v12 = vld [vmem:[%s4514_s1 + $0xac] sm:$0xf] }
  0x12   :  { %v2084_v9 = vor.u32 %v2887_v7, %v2083_v6  ;;  %v2931_v11 = vld [vmem:[%s4514_s1 + $0xb0] sm:$0xf0]  ;;  %v2262_v14 = vld [vmem:[%s4514_s1 + $0xb4] sm:$0xf0]  ;;  %v2268_v15 = vld [vmem:[%s4514_s1 + $0xb0] sm:$0xf] }
  0x13   :  { %v2261_v13 = vor.u32 %v2931_v11, %v2260_v10  ;;  %v2932_v16 = vld [vmem:[%s4514_s1 + $0xb8] sm:$0xf0]  ;;  %v2265_v17 = vor.u32 %v2930_v12, %v2262_v14  ;;  %v2248_v19 = vld [vmem:[%s4514_s1 + $0x90] sm:$0xf]  ;;  %v2927_v21 = vld [vmem:[%s4514_s1 + $0x94] sm:$0xf] }
  0x14   :  { %195 = vmatpush.bf16.msra.mxu0 %v2112_v39  ;;  %220 = vmatpush.bf16.msra.mxu2 %v2132_v44  ;;  %v2269_v18 = vor.u32 %v2932_v16, %v2268_v15  ;;  %v2928_v20 = vld [vmem:[%s4514_s1 + $0x98] sm:$0xf0]  ;;  %v2250_v23 = vld [vmem:[%s4514_s1 + $0x9c] sm:$0xf0]  ;;  %v2256_v24 = vld [vmem:[%s4514_s1 + $0x98] sm:$0xf] }
  0x15   :  { %208 = vmatpush.bf16.msra.mxu1 %v2116_v40  ;;  %447 = vmatpush.bf16.msra.mxu3 %v2261_v13  ;;  %v2249_v22 = vor.u32 %v2928_v20, %v2248_v19  ;;  %v2929_v25 = vld [vmem:[%s4514_s1 + $0xa0] sm:$0xf0]  ;;  %v2253_v26 = vor.u32 %v2927_v21, %v2250_v23  ;;  %v2236_v28 = vld [vmem:[%s4514_s1 + $0x78] sm:$0xf]  ;;  %v2924_v30 = vld [vmem:[%s4514_s1 + $0x7c] sm:$0xf] }
  0x16   :  { %v2257_v27 = vor.u32 %v2929_v25, %v2256_v24  ;;  %v2925_v29 = vld [vmem:[%s4514_s1 + $0x80] sm:$0xf0]  ;;  %v2238_v32 = vld [vmem:[%s4514_s1 + $0x84] sm:$0xf0]  ;;  %v2244_v33 = vld [vmem:[%s4514_s1 + $0x80] sm:$0xf] }
  0x17   :  { %v2237_v31 = vor.u32 %v2925_v29, %v2236_v28  ;;  %v2926_v34 = vld [vmem:[%s4514_s1 + $0x88] sm:$0xf0]  ;;  %v2241_v35 = vor.u32 %v2924_v30, %v2238_v32  ;;  %v2224_v37 = vld [vmem:[%s4514_s1 + $0x60] sm:$0xf]  ;;  %v2921_v39 = vld [vmem:[%s4514_s1 + $0x64] sm:$0xf] }
  0x18   :  { %196 = vmatpush.bf16.msra.mxu0 %v2100_v48  ;;  %221 = vmatpush.bf16.msra.mxu2 %v2120_v53  ;;  %v2245_v36 = vor.u32 %v2926_v34, %v2244_v33  ;;  %v2922_v38 = vld [vmem:[%s4514_s1 + $0x68] sm:$0xf0]  ;;  %v2226_v41 = vld [vmem:[%s4514_s1 + $0x6c] sm:$0xf0]  ;;  %v2232_v42 = vld [vmem:[%s4514_s1 + $0x68] sm:$0xf] }
  0x19   :  { %209 = vmatpush.bf16.msra.mxu1 %v2104_v49  ;;  %448 = vmatpush.bf16.msra.mxu3 %v2249_v22  ;;  %v2225_v40 = vor.u32 %v2922_v38, %v2224_v37  ;;  %v2229_v43 = vor.u32 %v2921_v39, %v2226_v41  ;;  %v2923_v44 = vld [vmem:[%s4514_s1 + $0x70] sm:$0xf0]  ;;  %v27_v45 = vld [vmem:[%s4517_s0] sm:$0xff]  ;;  %v28_v46 = vld [vmem:[%s4517_s0 + $0x8] sm:$0xff] }
  0x1a   :  { %v2233_v47 = vor.u32 %v2923_v44, %v2232_v42  ;;  %v2212_v48 = vld [vmem:[%s4514_s1 + $0x48] sm:$0xf]  ;;  %v2919_v49 = vld [vmem:[%s4514_s1 + $0x50] sm:$0xf0]  ;;  %v2918_v50 = vld [vmem:[%s4514_s1 + $0x4c] sm:$0xf] }
  0x1b   :  { %v2213_v52 = vor.u32 %v2919_v49, %v2212_v48  ;;  %v2214_v53 = vld [vmem:[%s4514_s1 + $0x54] sm:$0xf0]  ;;  %v2220_v54 = vld [vmem:[%s4514_s1 + $0x50] sm:$0xf]  ;;  %v2920_v55 = vld [vmem:[%s4514_s1 + $0x58] sm:$0xf0] }
  0x1c   :  { %197 = vmatpush.bf16.msra.mxu0 %v2088_v57  ;;  %222 = vmatpush.bf16.msra.mxu2 %v2108_v62  ;;  %v2221_v59 = vor.u32 %v2920_v55, %v2220_v54  ;;  %v2200_v62 = vld [vmem:[%s4514_s1 + $0x30] sm:$0xf]  ;;  %v2916_v63 = vld [vmem:[%s4514_s1 + $0x38] sm:$0xf0]  ;;  %v2208_v6 = vld [vmem:[%s4514_s1 + $0x38] sm:$0xf] }
  0x1d   :  { %210 = vmatpush.bf16.msra.mxu1 %v2092_v58  ;;  %449 = vmatpush.bf16.msra.mxu3 %v2237_v31  ;;  %v2217_v58 = vor.u32 %v2918_v50, %v2214_v53  ;;  %v2201_v1 = vor.u32 %v2916_v63, %v2200_v62  ;;  %v2917_v7 = vld [vmem:[%s4514_s1 + $0x40] sm:$0xf0]  ;;  %v2912_v11 = vld [vmem:[%s4514_s1 + $0x1c] sm:$0xf]  ;;  %v2190_v12 = vld [vmem:[%s4514_s1 + $0x24] sm:$0xf0] }
  0x1e   :  { %v2913_v10 = vld [vmem:[%s4514_s1 + $0x20] sm:$0xf0]  ;;  %v2193_v14 = vor.u32 %v2912_v11, %v2190_v12  ;;  %v2196_v15 = vld [vmem:[%s4514_s1 + $0x20] sm:$0xf]  ;;  %v2914_v16 = vld [vmem:[%s4514_s1 + $0x28] sm:$0xf0] }
  0x1f   :  { %v2197_v19 = vor.u32 %v2914_v16, %v2196_v15  ;;  %v2910_v20 = vld [vmem:[%s4514_s1 + $0x8] sm:$0xf0]  ;;  %v2909_v21 = vld [vmem:[%s4514_s1 + $0x4] sm:$0xf]  ;;  %v2178_v22 = vld [vmem:[%s4514_s1 + $0xc] sm:$0xf0] }
  0x20   :  { %198 = vmatpush.bf16.msra.mxu0 %v2076_v2  ;;  %223 = vmatpush.bf16.msra.mxu2 %v2096_v5  ;;  %v2915_v2 = vld [vmem:[%s4514_s1 + $0x34] sm:$0xf]  ;;  %v2184_v24 = vld [vmem:[%s4514_s1 + $0x8] sm:$0xf]  ;;  %v2181_v29 = vor.u32 %v2909_v21, %v2178_v22  ;;  %v2350_v11 = vld [vmem:[%s4514_s1 + $0x90] sm:$0xf] }
  0x21   :  { %211 = vmatpush.bf16.msra.mxu1 %v2080_v4  ;;  %450 = vmatpush.bf16.msra.mxu3 %v2225_v40  ;;  %v2202_v4 = vld [vmem:[%s4514_s1 + $0x3c] sm:$0xf0]  ;;  %v2911_v25 = vld [vmem:[%s4514_s1 + $0x10] sm:$0xf0]  ;;  %v2952_v12 = vld [vmem:[%s4514_s1 + $0x98] sm:$0xf0] }
  0x22   :  { %v2205_v5 = vor.u32 %v2915_v2, %v2202_v4  ;;  %v2185_v32 = vor.u32 %v2911_v25, %v2184_v24  ;;  %v3493_v40 = vld [vmem:[%s4516_s2] ss:$0 sm:$0xff]  ;;  %v29_v50 = vld [vmem:[%s4517_s0 + $0x10] sm:$0xff]  ;;  %v2362_v2 = vld [vmem:[%s4514_s1 + $0xa8] sm:$0xf] }
  0x23   :  { %199 = vmatmul.bf16.vlgmr.msra.gmra.mxu0 %v30_v8  ;;  %v2954_v4 = vld [vmem:[%s4514_s1 + $0xac] sm:$0xf]  ;;  %v2352_v15 = vld [vmem:[%s4514_s1 + $0x9c] sm:$0xf0]  ;;  %v2358_v16 = vld [vmem:[%s4514_s1 + $0x98] sm:$0xf] }
  0x24   :  { %212 = vmatmul.bf16.vlgmr.msra.gmra.mxu1 %v30_v8  ;;  %224 = vmatpush.bf16.msra.mxu2 %v2084_v9  ;;  %v2209_v9 = vor.u32 %v2917_v7, %v2208_v6  ;;  %v2364_v6 = vld [vmem:[%s4514_s1 + $0xb4] sm:$0xf0]  ;;  %v2370_v7 = vld [vmem:[%s4514_s1 + $0xb0] sm:$0xf]  ;;  %v2949_v22 = vld [vmem:[%s4514_s1 + $0x80] sm:$0xf0] }
  0x25   :  { %460 = vmatpush.bf16.msrb.mxu0 %v2265_v17  ;;  %473 = vmatpush.bf16.msrb.mxu1 %v2269_v18  ;;  %v2176_v17 = vld [vmem:[%s4514_s1] sm:$0xf]  ;;  %v2338_v21 = vld [vmem:[%s4514_s1 + $0x78] sm:$0xf]  ;;  %v2340_v25 = vld [vmem:[%s4514_s1 + $0x84] sm:$0xf0] }
  0x26   :  { %451 = vmatpush.bf16.msra.mxu3 %v2213_v52  ;;  %v2339_v24 = vor.u32 %v2949_v22, %v2338_v21  ;;  %v2286_v21 = vld [vmem:[%s4514_s1 + $0x8] sm:$0xf]  ;;  %v2935_v22 = vld [vmem:[%s4514_s1 + $0x10] sm:$0xf0] }
  0x27   :  { %225 = vmatmul.bf16.vlgmr.msra.gmra.mxu2 %v30_v8  ;;  %v2188_v8 = vld [vmem:[%s4514_s1 + $0x18] sm:$0xf] }
  0x28   :  { %v2189_v13 = vor.u32 %v2913_v10, %v2188_v8  ;;  %v2956_v8 = vld [vmem:[%s4514_s1 + $0xb8] sm:$0xf0] }
  0x29   :  { %461 = vmatpush.bf16.msrb.mxu0 %v2253_v26  ;;  %474 = vmatpush.bf16.msrb.mxu1 %v2257_v27  ;;  %v2177_v26 = vor.u32 %v2910_v20, %v2176_v17  ;;  %v2371_v10 = vor.u32 %v2956_v8, %v2370_v7  ;;  %v2953_v17 = vld [vmem:[%s4514_s1 + $0xa0] sm:$0xf0]  ;;  %v2936_v7 = vld [vmem:[%s4514_s1 + $0x1c] sm:$0xf]  ;;  %v2292_v8 = vld [vmem:[%s4514_s1 + $0x24] sm:$0xf0] }
  0x2a   :  { %452 = vmatpush.bf16.msra.mxu3 %v2201_v1  ;;  %v2172_v20 = vld [vmem:[%s4517_s0 + $0x20] sm:$0xff] }
  0x2d   :  { %462 = vmatpush.bf16.msrb.mxu0 %v2241_v35  ;;  %475 = vmatpush.bf16.msrb.mxu1 %v2245_v36 }
  0x2e   :  { %453 = vmatpush.bf16.msra.mxu3 %v2189_v13  ;;  %v2951_v13 = vld [vmem:[%s4514_s1 + $0x94] sm:$0xf] }
  0x31   :  { %463 = vmatpush.bf16.msrb.mxu0 %v2229_v43  ;;  %476 = vmatpush.bf16.msrb.mxu1 %v2233_v47 }
  0x32   :  { %454 = vmatpush.bf16.msra.mxu3 %v2177_v26  ;;  %v2346_v26 = vld [vmem:[%s4514_s1 + $0x80] sm:$0xf] }
  0x35   :  { %464 = vmatpush.bf16.msrb.mxu0 %v2217_v58  ;;  %477 = vmatpush.bf16.msrb.mxu1 %v2221_v59 }
  0x39   :  { %465 = vmatpush.bf16.msrb.mxu0 %v2205_v5  ;;  %478 = vmatpush.bf16.msrb.mxu1 %v2209_v9  ;;  %v2367_v9 = vor.u32 %v2954_v4, %v2364_v6  ;;  %v2937_v6 = vld [vmem:[%s4514_s1 + $0x20] sm:$0xf0] }
  0x3b   :  { %714 = vmatpush.bf16.msrb.mxu3 %v2367_v9  ;;  %v2298_v9 = vld [vmem:[%s4514_s1 + $0x20] sm:$0xf] }
  0x3d   :  { %466 = vmatpush.bf16.msrb.mxu0 %v2193_v14  ;;  %479 = vmatpush.bf16.msrb.mxu1 %v2197_v19  ;;  %v2351_v14 = vor.u32 %v2952_v12, %v2350_v11  ;;  %v2359_v19 = vor.u32 %v2953_v17, %v2358_v16  ;;  %v2938_v11 = vld [vmem:[%s4514_s1 + $0x28] sm:$0xf0]  ;;  %v2278_v16 = vld [vmem:[%s4514_s1] sm:$0xf] }
  0x3e   :  { %v2934_v17 = vld [vmem:[%s4514_s1 + $0x8] sm:$0xf0] }
  0x41   :  { %467 = vmatpush.bf16.msrb.mxu0 %v2181_v29  ;;  %480 = vmatpush.bf16.msrb.mxu1 %v2185_v32 }
  0x45   :  { %727 = vmatpush.bf16.msra.mxu0 %v2371_v10 }
  0x49   :  { %728 = vmatpush.bf16.msra.mxu0 %v2359_v19 }
  0xa0   :  { %v200_v51 = vpop.f32.mrf.mxu0 }
  0xa1   :  { %v230_v56 = vadd.f32 %v200_v51, %v27_v45  ;;  %v213_v57 = vpop.f32.mrf.mxu1 }
  0xa2   :  { %v250_v60 = vadd.f32 %v213_v57, %v28_v46 }
  0xa3   :  { %v2169_v61 = vmul.f32 -1.442695, %v230_v56 }
  0xa4   :  { %v2170_v0 = vmul.f32 -1.442695, %v250_v60 }
  0xa5   :  { %3078 = vpow2.f32 %v2169_v61 }
  0xa6   :  { %3080 = vpow2.f32 %v2170_v0 }
  0xa8   :  { %v202_v18 = vpop.f32.mrf.mxu0 }
  0xa9   :  { %v215_v23 = vpop.f32.mrf.mxu1  ;;  %v2355_v18 = vor.u32 %v2951_v13, %v2352_v15  ;;  %v2299_v15 = vor.u32 %v2938_v11, %v2298_v9  ;;  %v2460_v9 = vld [vmem:[%s4514_s1 + $0x98] sm:$0xf] }
  0xaa   :  { %v226_v28 = vpop.f32.mrf.mxu2  ;;  %v2948_v23 = vld [vmem:[%s4514_s1 + $0x7c] sm:$0xf] }
  0xab   :  { %v3079_v27 = vpop.eup %3078  ;;  %v273_v47 = vadd.f32 %v3493_v40, %v226_v28  ;;  %715 = vmatpush.bf16.msrb.mxu3 %v2355_v18  ;;  %v2343_v28 = vor.u32 %v2948_v23, %v2340_v25  ;;  %v2933_v18 = vld [vmem:[%s4514_s1 + $0x4] sm:$0xf]  ;;  %v2279_v23 = vor.u32 %v2934_v17, %v2278_v16  ;;  %v2442_v17 = vld [vmem:[%s4514_s1 + $0x84] sm:$0xf0] }
  0xac   :  { %v3081_v30 = vpop.eup %3080  ;;  %v234_v31 = vadd.f32 1.0, %v3079_v27  ;;  %v2950_v27 = vld [vmem:[%s4514_s1 + $0x88] sm:$0xf0] }
  0xad   :  { %v254_v33 = vadd.f32 1.0, %v3081_v30  ;;  %v2347_v29 = vor.u32 %v2950_v27, %v2346_v26  ;;  %v2287_v26 = vor.u32 %v2935_v22, %v2286_v21 }
  0xae   :  { %3082 = vrcp.f32 %v234_v31  ;;  %v246_v42 = vand.u32 2147483648, %v234_v31  ;;  %v244_v44 = vand.u32 2147483647, %v234_v31  ;;  %vm240_vm1 = vweird.f32 %v234_v31 }
  0xaf   :  { %3084 = vrcp.f32 %v254_v33  ;;  %vm260_vm4 = vweird.f32 %v254_v33  ;;  %v266_v53 = vand.u32 2147483648, %v254_v33  ;;  %v264_v55 = vand.u32 2147483647, %v254_v33  ;;  %716 = vmatpush.bf16.msrb.mxu3 %v2343_v28  ;;  %729 = vmatpush.bf16.msra.mxu0 %v2347_v29 }
  0xb0   :  { %v247_v48 = vor.u32 1.1754944e-38, %v246_v42  ;;  %vm245_vm3 = vcmp.eq.f32.partialorder %v244_v44, 8.507059e+37  ;;  %v2171_v44 = vld [vmem:[%s4517_s0 + $0x18] sm:$0xff] }
  0xb1   :  { %v267_v58 = vor.u32 1.1754944e-38, %v266_v53  ;;  %vm265_vm7 = vcmp.eq.f32.partialorder %v264_v55, 8.507059e+37 }
  0xb2   :  { %v228_v34 = vpop.f32.mrf.mxu2 }
  0xb3   :  { %v2946_v34 = vld [vmem:[%s4514_s1 + $0x68] sm:$0xf0] }
  0xb4   :  { %v3083_v35 = vpop.eup %3082 }
  0xb5   :  { %v3085_v36 = vpop.eup %3084  ;;  %v236_v37 = vmul.f32 %v3083_v35, %v234_v31  ;;  %vm241_vm0 = vweird.f32 %v3083_v35 }
  0xb6   :  { %v256_v38 = vmul.f32 %v3085_v36, %v254_v33  ;;  %vm242_vm2 = vmor %vm240_vm1, %vm241_vm0  ;;  %vm261_vm5 = vweird.f32 %v3085_v36  ;;  %v2326_v33 = vld [vmem:[%s4514_s1 + $0x60] sm:$0xf] }
  0xb7   :  { %v237_v39 = vsub.f32 1.0, %v236_v37  ;;  %vm262_vm6 = vmor %vm260_vm4, %vm261_vm5  ;;  %v2328_v37 = vld [vmem:[%s4514_s1 + $0x6c] sm:$0xf0] }
  0xb8   :  { %v257_v41 = vsub.f32 1.0, %v256_v38  ;;  %v2334_v38 = vld [vmem:[%s4514_s1 + $0x68] sm:$0xf] }
  0xb9   :  { %v238_v43 = vmul.f32 %v3083_v35, %v237_v39  ;;  %v2947_v39 = vld [vmem:[%s4514_s1 + $0x70] sm:$0xf0] }
  0xba   :  { %v258_v45 = vmul.f32 %v3085_v36, %v257_v41 }
  0xbb   :  { %v239_v46 = vadd.f32 %v3083_v35, %v238_v43  ;;  %v2335_v43 = vor.u32 %v2947_v39, %v2334_v38 }
  0xbc   :  { %v259_v52 = vadd.f32 %v3085_v36, %v258_v45  ;;  %v2314_v45 = vld [vmem:[%s4514_s1 + $0x48] sm:$0xf] }
  0xbd   :  { %v243_v49 = vsel %vm242_vm2, %v3083_v35, %v239_v46  ;;  %v2945_v35 = vld [vmem:[%s4514_s1 + $0x64] sm:$0xf]  ;;  %730 = vmatpush.bf16.msra.mxu0 %v2335_v43  ;;  %v2943_v46 = vld [vmem:[%s4514_s1 + $0x50] sm:$0xf0] }
  0xbe   :  { %v248_v51 = vsel %vm245_vm3, %v247_v48, %v243_v49  ;;  %v263_v57 = vsel %vm262_vm6, %v3085_v36, %v259_v52  ;;  %v2327_v36 = vor.u32 %v2946_v34, %v2326_v33  ;;  %v2331_v42 = vor.u32 %v2945_v35, %v2328_v37  ;;  %v2944_v52 = vld [vmem:[%s4514_s1 + $0x58] sm:$0xf0] }
  0xbf   :  { %v274_v54 = vmul.f32 %v273_v47, %v248_v51  ;;  %v268_v59 = vsel %vm265_vm7, %v267_v58, %v263_v57  ;;  %v2942_v47 = vld [vmem:[%s4514_s1 + $0x4c] sm:$0xf]  ;;  %v2315_v49 = vor.u32 %v2943_v46, %v2314_v45  ;;  %v2322_v51 = vld [vmem:[%s4514_s1 + $0x50] sm:$0xf]  ;;  %v2940_v57 = vld [vmem:[%s4514_s1 + $0x38] sm:$0xf0] }
  0xc0   :  { %v277_v60 = vsub.f32 1.0, %v268_v59  ;;  %v279_v63 = vmul.f32 %v268_v59, %v3330_v3  ;;  %v2955_v3 = vld [vmem:[%s4514_s1 + $0xb0] sm:$0xf0]  ;;  %717 = vmatpush.bf16.msrb.mxu3 %v2331_v42  ;;  %v2323_v55 = vor.u32 %v2944_v52, %v2322_v51  ;;  %v2173_v45 = vld [vmem:[%s4517_s0 + $0x28] sm:$0xff] }
  0xc1   :  { %v275_v56 = vadd.f32 %v274_v54, %v29_v50  ;;  %v2363_v5 = vor.u32 %v2955_v3, %v2362_v2  ;;  %v2316_v50 = vld [vmem:[%s4514_s1 + $0x54] sm:$0xf0]  ;;  %v2939_v58 = vld [vmem:[%s4514_s1 + $0x34] sm:$0xf] }
  0xc2   :  { %v2319_v54 = vor.u32 %v2942_v47, %v2316_v50  ;;  %731 = vmatpush.bf16.msra.mxu0 %v2323_v55 }
  0xc3   :  { %3086 = vtanh.f32 %v275_v56  ;;  %701 = vmatpush.bf16.msrb.mxu2 %v2363_v5  ;;  %v2302_v56 = vld [vmem:[%s4514_s1 + $0x30] sm:$0xf]  ;;  %v2290_v5 = vld [vmem:[%s4514_s1 + $0x18] sm:$0xf] }
  0xc4   :  { %718 = vmatpush.bf16.msrb.mxu3 %v2319_v54  ;;  %v2291_v13 = vor.u32 %v2937_v6, %v2290_v5  ;;  %v2976_v5 = vld [vmem:[%s4514_s1 + $0x98] sm:$0xf0]  ;;  %v2975_v6 = vld [vmem:[%s4514_s1 + $0x94] sm:$0xf] }
  0xc7   :  { %702 = vmatpush.bf16.msrb.mxu2 %v2351_v14  ;;  %v2295_v14 = vor.u32 %v2936_v7, %v2292_v8  ;;  %v2454_v8 = vld [vmem:[%s4514_s1 + $0x9c] sm:$0xf0] }
  0xc8   :  { %v2457_v11 = vor.u32 %v2975_v6, %v2454_v8  ;;  %v2380_v6 = vld [vmem:[%s4514_s1] sm:$0xf]  ;;  %v2957_v8 = vld [vmem:[%s4514_s1 + $0x4] sm:$0xf] }
  0xc9   :  { %v3087_v61 = vpop.eup %3086 }
  0xca   :  { %v278_v62 = vmul.f32 %v3087_v61, %v277_v60  ;;  %v2303_v60 = vor.u32 %v2940_v57, %v2302_v56  ;;  %v2304_v61 = vld [vmem:[%s4514_s1 + $0x3c] sm:$0xf0] }
  0xcb   :  { %703 = vmatpush.bf16.msrb.mxu2 %v2339_v24  ;;  %v2307_v3 = vor.u32 %v2939_v58, %v2304_v61 }
  0xcc   :  { %v3500_v0 = vadd.f32 %v279_v63, %v278_v62  ;;  %v2310_v62 = vld [vmem:[%s4514_s1 + $0x38] sm:$0xf]  ;;  %v2941_v63 = vld [vmem:[%s4514_s1 + $0x40] sm:$0xf0] }
  0xcd   :  { %v2311_v4 = vor.u32 %v2941_v63, %v2310_v62  ;;  %719 = vmatpush.bf16.msrb.mxu3 %v2307_v3  ;;  %v2466_v62 = vld [vmem:[%s4514_s1 + $0xb4] sm:$0xf0]  ;;  %v2472_v63 = vld [vmem:[%s4514_s1 + $0xb0] sm:$0xf] }
  0xce   :  { %281 = vst [vmem:[%s4518_s4] sm:$0xff] %v3500_v0  ;;  %v286_v1 = vpack.c.bf16 %v3500_v0, %v3500_v0 }
  0xcf   :  { %704 = vmatpush.bf16.msrb.mxu2 %v2327_v36  ;;  %732 = vmatpush.bf16.msra.mxu0 %v2311_v4  ;;  %v2452_v4 = vld [vmem:[%s4514_s1 + $0x90] sm:$0xf] }
  0xd0   :  { %455 = vmatmul.bf16.vlgmr.msra.gmra.mxu3 %v286_v1  ;;  %468 = vmatmul.bf16.vlgmr.msrb.gmra.mxu0 %v286_v1  ;;  %v2453_v7 = vor.u32 %v2976_v5, %v2452_v4 }
  0xd1   :  { %481 = vmatmul.bf16.vlgmr.msrb.gmra.mxu1 %v286_v1  ;;  %720 = vmatpush.bf16.msrb.mxu3 %v2295_v14  ;;  %v2973_v14 = vld [vmem:[%s4514_s1 + $0x80] sm:$0xf0] }
  0xd3   :  { %705 = vmatpush.bf16.msrb.mxu2 %v2315_v49  ;;  %733 = vmatpush.bf16.msra.mxu0 %v2299_v15  ;;  %v2972_v15 = vld [vmem:[%s4514_s1 + $0x7c] sm:$0xf] }
  0xd7   :  { %706 = vmatpush.bf16.msrb.mxu2 %v2303_v60  ;;  %734 = vmatpush.bf16.msra.mxu0 %v2287_v26  ;;  %v2978_v60 = vld [vmem:[%s4514_s1 + $0xac] sm:$0xf] }
  0xdb   :  { %707 = vmatpush.bf16.msrb.mxu2 %v2291_v13  ;;  %v2440_v13 = vld [vmem:[%s4514_s1 + $0x78] sm:$0xf] }
  0xdc   :  { %v2441_v16 = vor.u32 %v2973_v14, %v2440_v13  ;;  %v2959_v13 = vld [vmem:[%s4514_s1 + $0x10] sm:$0xf0] }
  0xdf   :  { %708 = vmatpush.bf16.msrb.mxu2 %v2279_v23  ;;  %v2428_v23 = vld [vmem:[%s4514_s1 + $0x60] sm:$0xf] }
 0x14d   :  { %v469_v30 = vpop.f32.mrf.mxu0 }
 0x14e   :  { %v506_v31 = vadd.f32 %v2172_v20, %v469_v30  ;;  %v3565_v32 = vpop.f32.mrf.mxu1  ;;  %v2280_v20 = vld [vmem:[%s4514_s1 + $0xc] sm:$0xf0] }
 0x14f   :  { %v2283_v25 = vor.u32 %v2933_v18, %v2280_v20  ;;  %v526_v42 = vadd.f32 %v3493_v40, %v3565_v32  ;;  %v2448_v18 = vld [vmem:[%s4514_s1 + $0x80] sm:$0xf]  ;;  %v2445_v20 = vor.u32 %v2972_v15, %v2442_v17 }
 0x150   :  { %v2271_v41 = vmul.f32 -1.442695, %v506_v31 }
 0x151   :  { %721 = vmatpush.bf16.msrb.mxu3 %v2283_v25  ;;  %v2969_v25 = vld [vmem:[%s4514_s1 + $0x64] sm:$0xf] }
 0x152   :  { %3088 = vpow2.f32 %v2271_v41 }
 0x153   :  { %v456_v48 = vpop.f32.mrf.mxu3 }
 0x154   :  { %v486_v53 = vadd.f32 %v2171_v44, %v456_v48 }
 0x155   :  { %v471_v59 = vpop.f32.mrf.mxu0 }
 0x156   :  { %v2270_v1 = vmul.f32 -1.442695, %v486_v53  ;;  %v484_v2 = vpop.f32.mrf.mxu1  ;;  %v2464_v59 = vld [vmem:[%s4514_s1 + $0xa8] sm:$0xf] }
 0x157   :  { %v2469_v2 = vor.u32 %v2978_v60, %v2466_v62  ;;  %v2392_v60 = vld [vmem:[%s4514_s1 + $0x18] sm:$0xf]  ;;  %v2960_v62 = vld [vmem:[%s4514_s1 + $0x1c] sm:$0xf] }
 0x158   :  { %v3089_v10 = vpop.eup %3088  ;;  %3090 = vpow2.f32 %v2270_v1  ;;  %v2980_v1 = vld [vmem:[%s4514_s1 + $0xb8] sm:$0xf0] }
 0x159   :  { %v510_v12 = vadd.f32 1.0, %v3089_v10  ;;  %v2473_v3 = vor.u32 %v2980_v1, %v2472_v63  ;;  %968 = vmatpush.bf16.msra.mxu2 %v2469_v2  ;;  %v2977_v10 = vld [vmem:[%s4514_s1 + $0xa0] sm:$0xf0]  ;;  %v2394_v63 = vld [vmem:[%s4514_s1 + $0x24] sm:$0xf0] }
 0x15a   :  { %v2400_v1 = vld [vmem:[%s4514_s1 + $0x20] sm:$0xf]  ;;  %v2962_v2 = vld [vmem:[%s4514_s1 + $0x28] sm:$0xf0]  ;;  %v2397_v4 = vor.u32 %v2960_v62, %v2394_v63  ;;  %v2999_v62 = vld [vmem:[%s4514_s1 + $0x94] sm:$0xf] }
 0x15b   :  { %v458_v19 = vpop.f32.mrf.mxu3  ;;  %3092 = vrcp.f32 %v510_v12  ;;  %v522_v47 = vand.u32 2147483648, %v510_v12  ;;  %vm516_vm13 = vweird.f32 %v510_v12  ;;  %v520_v49 = vand.u32 2147483647, %v510_v12  ;;  %981 = vmatpush.bf16.msra.mxu3 %v2473_v3 }
 0x15c   :  { %v2974_v19 = vld [vmem:[%s4514_s1 + $0x88] sm:$0xf0]  ;;  %v2401_v5 = vor.u32 %v2962_v2, %v2400_v1  ;;  %v2556_v1 = vld [vmem:[%s4514_s1 + $0x9c] sm:$0xf0]  ;;  %v2562_v2 = vld [vmem:[%s4514_s1 + $0x98] sm:$0xf] }
 0x15d   :  { %v523_v52 = vor.u32 1.1754944e-38, %v522_v47  ;;  %vm521_vm15 = vcmp.eq.f32.partialorder %v520_v49, 8.507059e+37  ;;  %969 = vmatpush.bf16.msra.mxu2 %v2457_v11  ;;  %v2449_v21 = vor.u32 %v2974_v19, %v2448_v18  ;;  %v2404_v49 = vld [vmem:[%s4514_s1 + $0x30] sm:$0xf] }
 0x15e   :  { %v3091_v24 = vpop.eup %3090  ;;  %v2382_v11 = vld [vmem:[%s4514_s1 + $0xc] sm:$0xf0] }
 0x15f   :  { %v490_v27 = vadd.f32 1.0, %v3091_v24  ;;  %v2970_v24 = vld [vmem:[%s4514_s1 + $0x68] sm:$0xf0] }
 0x160   :  { %v2429_v26 = vor.u32 %v2970_v24, %v2428_v23 }
 0x161   :  { %3094 = vrcp.f32 %v490_v27  ;;  %v3093_v28 = vpop.eup %3092  ;;  %v502_v35 = vand.u32 2147483648, %v490_v27  ;;  %v500_v37 = vand.u32 2147483647, %v490_v27  ;;  %vm496_vm9 = vweird.f32 %v490_v27  ;;  %970 = vmatpush.bf16.msra.mxu2 %v2445_v20 }
 0x162   :  { %v512_v29 = vmul.f32 %v3093_v28, %v510_v12  ;;  %vm517_vm12 = vweird.f32 %v3093_v28  ;;  %v2461_v12 = vor.u32 %v2977_v10, %v2460_v9 }
 0x163   :  { %v503_v41 = vor.u32 1.1754944e-38, %v502_v35  ;;  %vm501_vm11 = vcmp.eq.f32.partialorder %v500_v37, 8.507059e+37  ;;  %vm518_vm14 = vmor %vm516_vm13, %vm517_vm12  ;;  %v2416_v35 = vld [vmem:[%s4514_s1 + $0x48] sm:$0xf]  ;;  %v2966_v37 = vld [vmem:[%s4514_s1 + $0x4c] sm:$0xf] }
 0x164   :  { %v513_v33 = vsub.f32 1.0, %v512_v29  ;;  %982 = vmatpush.bf16.msra.mxu3 %v2461_v12  ;;  %v2971_v29 = vld [vmem:[%s4514_s1 + $0x70] sm:$0xf0]  ;;  %v2388_v12 = vld [vmem:[%s4514_s1 + $0x8] sm:$0xf] }
 0x165   :  { %v2389_v17 = vor.u32 %v2959_v13, %v2388_v12  ;;  %v2998_v12 = vld [vmem:[%s4514_s1 + $0x88] sm:$0xf0] }
 0x166   :  { %v514_v38 = vmul.f32 %v3093_v28, %v513_v33  ;;  %v2273_v33 = vld [vmem:[%s4517_s0 + $0x30] sm:$0xff] }
 0x167   :  { %v3095_v30 = vpop.eup %3094 }
 0x168   :  { %v492_v31 = vmul.f32 %v3095_v30, %v490_v27  ;;  %vm497_vm8 = vweird.f32 %v3095_v30  ;;  %v515_v46 = vadd.f32 %v3093_v28, %v514_v38  ;;  %983 = vmatpush.bf16.msra.mxu3 %v2449_v21  ;;  %v2430_v27 = vld [vmem:[%s4514_s1 + $0x6c] sm:$0xf0] }
 0x169   :  { %vm498_vm10 = vmor %vm496_vm9, %vm497_vm8 }
 0x16a   :  { %v493_v34 = vsub.f32 1.0, %v492_v31  ;;  %v519_v51 = vsel %vm518_vm14, %v3093_v28, %v515_v46  ;;  %v2436_v28 = vld [vmem:[%s4514_s1 + $0x68] sm:$0xf] }
 0x16b   :  { %v524_v32 = vsel %vm521_vm15, %v523_v52, %v519_v51  ;;  %v2437_v31 = vor.u32 %v2971_v29, %v2436_v28  ;;  %v2963_v51 = vld [vmem:[%s4514_s1 + $0x34] sm:$0xf] }
 0x16c   :  { %v494_v36 = vmul.f32 %v3095_v30, %v493_v34  ;;  %v530_v53 = vsub.f32 1.0, %v524_v32  ;;  %v532_v56 = vmul.f32 %v524_v32, %v3500_v0  ;;  %v2979_v0 = vld [vmem:[%s4514_s1 + $0xb0] sm:$0xf0]  ;;  %v2274_v34 = vld [vmem:[%s4517_s0 + $0x38] sm:$0xff]  ;;  %v2406_v32 = vld [vmem:[%s4514_s1 + $0x3c] sm:$0xf0] }
 0x16d   :  { %v2465_v61 = vor.u32 %v2979_v0, %v2464_v59  ;;  %984 = vmatpush.bf16.msra.mxu3 %v2437_v31  ;;  %v2409_v59 = vor.u32 %v2963_v51, %v2406_v32  ;;  %v2566_v32 = vld [vmem:[%s4514_s1 + $0xa8] sm:$0xf] }
 0x16e   :  { %v495_v39 = vadd.f32 %v3095_v30, %v494_v36  ;;  %v2967_v36 = vld [vmem:[%s4514_s1 + $0x50] sm:$0xf0] }
 0x16f   :  { %955 = vmatpush.bf16.msra.mxu1 %v2465_v61  ;;  %v2961_v61 = vld [vmem:[%s4514_s1 + $0x20] sm:$0xf0] }
 0x170   :  { %v499_v43 = vsel %vm498_vm10, %v3095_v30, %v495_v39  ;;  %v2433_v30 = vor.u32 %v2969_v25, %v2430_v27  ;;  %v2393_v3 = vor.u32 %v2961_v61, %v2392_v60  ;;  %v2554_v60 = vld [vmem:[%s4514_s1 + $0x90] sm:$0xf]  ;;  %v3000_v61 = vld [vmem:[%s4514_s1 + $0x98] sm:$0xf0] }
 0x171   :  { %v504_v44 = vsel %vm501_vm11, %v503_v41, %v499_v43  ;;  %v2417_v41 = vor.u32 %v2967_v36, %v2416_v35  ;;  %v2424_v43 = vld [vmem:[%s4514_s1 + $0x50] sm:$0xf]  ;;  %v2555_v63 = vor.u32 %v3000_v61, %v2554_v60 }
 0x172   :  { %v527_v48 = vmul.f32 %v526_v42, %v504_v44  ;;  %971 = vmatpush.bf16.msra.mxu2 %v2433_v30  ;;  %v2418_v42 = vld [vmem:[%s4514_s1 + $0x54] sm:$0xf0]  ;;  %v2968_v44 = vld [vmem:[%s4514_s1 + $0x58] sm:$0xf0] }
 0x173   :  { %956 = vmatpush.bf16.msra.mxu1 %v2453_v7  ;;  %v2421_v47 = vor.u32 %v2966_v37, %v2418_v42  ;;  %v2958_v7 = vld [vmem:[%s4514_s1 + $0x8] sm:$0xf0] }
 0x174   :  { %v528_v50 = vadd.f32 %v2173_v45, %v527_v48  ;;  %v2425_v48 = vor.u32 %v2968_v44, %v2424_v43  ;;  %v2381_v14 = vor.u32 %v2958_v7, %v2380_v6  ;;  %v2542_v6 = vld [vmem:[%s4514_s1 + $0x78] sm:$0xf]  ;;  %v2997_v7 = vld [vmem:[%s4514_s1 + $0x80] sm:$0xf0] }
 0x176   :  { %3096 = vtanh.f32 %v528_v50  ;;  %v2964_v50 = vld [vmem:[%s4514_s1 + $0x38] sm:$0xf0]  ;;  %972 = vmatpush.bf16.msra.mxu2 %v2421_v47  ;;  %985 = vmatpush.bf16.msra.mxu3 %v2425_v48 }
 0x177   :  { %957 = vmatpush.bf16.msra.mxu1 %v2441_v16  ;;  %v2405_v52 = vor.u32 %v2964_v50, %v2404_v49  ;;  %v2385_v16 = vor.u32 %v2957_v8, %v2382_v11  ;;  %v2996_v8 = vld [vmem:[%s4514_s1 + $0x7c] sm:$0xf]  ;;  %v2550_v11 = vld [vmem:[%s4514_s1 + $0x80] sm:$0xf] }
 0x17a   :  { %973 = vmatpush.bf16.msra.mxu2 %v2409_v59 }
 0x17b   :  { %958 = vmatpush.bf16.msra.mxu1 %v2429_v26 }
 0x17c   :  { %v3097_v54 = vpop.eup %3096 }
 0x17d   :  { %v531_v55 = vmul.f32 %v3097_v54, %v530_v53  ;;  %v2412_v53 = vld [vmem:[%s4514_s1 + $0x38] sm:$0xf]  ;;  %v2965_v54 = vld [vmem:[%s4514_s1 + $0x40] sm:$0xf0] }
 0x17e   :  { %v2413_v0 = vor.u32 %v2965_v54, %v2412_v53  ;;  %974 = vmatpush.bf16.msra.mxu2 %v2397_v4  ;;  %v3002_v53 = vld [vmem:[%s4514_s1 + $0xac] sm:$0xf]  ;;  %v2559_v4 = vor.u32 %v2999_v62, %v2556_v1  ;;  %v2482_v62 = vld [vmem:[%s4514_s1] sm:$0xf]  ;;  %v2981_v1 = vld [vmem:[%s4514_s1 + $0x4] sm:$0xf] }
 0x17f   :  { %v3666_v57 = vadd.f32 %v532_v56, %v531_v55  ;;  %959 = vmatpush.bf16.msra.mxu1 %v2417_v41 }
 0x180   :  { %986 = vmatpush.bf16.msra.mxu3 %v2413_v0 }
 0x181   :  { %2272 = vst [vmem:[%s4518_s4 + $0x8] sm:$0xff] %v3666_v57  ;;  %v540_v58 = vpack.c.bf16 %v3666_v57, %v3666_v57 }
 0x182   :  { %975 = vmatpush.bf16.msra.mxu2 %v2385_v16  ;;  %v2994_v16 = vld [vmem:[%s4514_s1 + $0x68] sm:$0xf0] }
 0x183   :  { %709 = vmatmul.bf16.vlgmr.msrb.gmra.mxu2 %v540_v58  ;;  %722 = vmatmul.bf16.vlgmr.msrb.gmra.mxu3 %v540_v58 }
 0x184   :  { %735 = vmatmul.bf16.vlgmr.msra.gmra.mxu0 %v540_v58  ;;  %960 = vmatpush.bf16.msra.mxu1 %v2405_v52 }
 0x185   :  { %987 = vmatpush.bf16.msra.mxu3 %v2401_v5 }
 0x188   :  { %961 = vmatpush.bf16.msra.mxu1 %v2393_v3  ;;  %v3001_v3 = vld [vmem:[%s4514_s1 + $0xa0] sm:$0xf0] }
 0x189   :  { %988 = vmatpush.bf16.msra.mxu3 %v2389_v17  ;;  %v2563_v5 = vor.u32 %v3001_v3, %v2562_v2  ;;  %v2993_v17 = vld [vmem:[%s4514_s1 + $0x64] sm:$0xf] }
 0x18c   :  { %962 = vmatpush.bf16.msra.mxu1 %v2381_v14  ;;  %v2551_v14 = vor.u32 %v2998_v12, %v2550_v11 }
 0x201   :  { %v3728_v22 = vpop.f32.mrf.mxu0 }
 0x202   :  { %v780_v35 = vadd.f32 %v3493_v40, %v3728_v22 }
 0x206   :  { %v710_v38 = vpop.f32.mrf.mxu2  ;;  %v723_v39 = vpop.f32.mrf.mxu3 }
 0x207   :  { %v740_v45 = vadd.f32 %v2273_v33, %v710_v38  ;;  %v760_v46 = vadd.f32 %v2274_v34, %v723_v39  ;;  %v2275_v39 = vld [vmem:[%s4517_s0 + $0x40] sm:$0xff] }
 0x209   :  { %v2372_v55 = vmul.f32 -1.442695, %v740_v45  ;;  %v2373_v56 = vmul.f32 -1.442695, %v760_v46  ;;  %v738_v58 = vpop.f32.mrf.mxu0 }
 0x20a   :  { %v3004_v58 = vld [vmem:[%s4514_s1 + $0xb8] sm:$0xf0] }
 0x20b   :  { %3098 = vpow2.f32 %v2372_v55  ;;  %v2568_v55 = vld [vmem:[%s4514_s1 + $0xb4] sm:$0xf0] }
 0x20c   :  { %3100 = vpow2.f32 %v2373_v56  ;;  %v2574_v56 = vld [vmem:[%s4514_s1 + $0xb0] sm:$0xf]  ;;  %v2571_v59 = vor.u32 %v3002_v53, %v2568_v55  ;;  %v2984_v53 = vld [vmem:[%s4514_s1 + $0x1c] sm:$0xf] }
 0x20d   :  { %v2575_v0 = vor.u32 %v3004_v58, %v2574_v56  ;;  %v2496_v56 = vld [vmem:[%s4514_s1 + $0x24] sm:$0xf0]  ;;  %v2502_v58 = vld [vmem:[%s4514_s1 + $0x20] sm:$0xf] }
 0x20e   :  { %v712_v9 = vpop.f32.mrf.mxu2  ;;  %v725_v10 = vpop.f32.mrf.mxu3  ;;  %1222 = vmatpush.bf16.msrb.mxu1 %v2571_v59  ;;  %v2986_v59 = vld [vmem:[%s4514_s1 + $0x28] sm:$0xf0]  ;;  %v2499_v60 = vor.u32 %v2984_v53, %v2496_v56  ;;  %v3024_v53 = vld [vmem:[%s4514_s1 + $0x98] sm:$0xf0]  ;;  %v2658_v56 = vld [vmem:[%s4514_s1 + $0x9c] sm:$0xf0] }
 0x20f   :  { %1235 = vmatpush.bf16.msrb.mxu2 %v2575_v0  ;;  %v2543_v9 = vor.u32 %v2997_v7, %v2542_v6  ;;  %v2544_v10 = vld [vmem:[%s4514_s1 + $0x84] sm:$0xf0]  ;;  %v2503_v61 = vor.u32 %v2986_v59, %v2502_v58  ;;  %v2983_v6 = vld [vmem:[%s4514_s1 + $0x10] sm:$0xf0]  ;;  %v2664_v58 = vld [vmem:[%s4514_s1 + $0x98] sm:$0xf] }
 0x210   :  { %v2547_v13 = vor.u32 %v2996_v8, %v2544_v10  ;;  %v3025_v59 = vld [vmem:[%s4514_s1 + $0xa0] sm:$0xf0] }
 0x211   :  { %v3099_v15 = vpop.eup %3098 }
 0x212   :  { %v3101_v18 = vpop.eup %3100  ;;  %v744_v19 = vadd.f32 1.0, %v3099_v15  ;;  %1223 = vmatpush.bf16.msrb.mxu1 %v2559_v4  ;;  %v2530_v15 = vld [vmem:[%s4514_s1 + $0x60] sm:$0xf]  ;;  %v2484_v4 = vld [vmem:[%s4514_s1 + $0xc] sm:$0xf0] }
 0x213   :  { %v764_v20 = vadd.f32 1.0, %v3101_v18  ;;  %1236 = vmatpush.bf16.msrb.mxu2 %v2563_v5  ;;  %v2531_v18 = vor.u32 %v2994_v16, %v2530_v15  ;;  %v2490_v5 = vld [vmem:[%s4514_s1 + $0x8] sm:$0xf]  ;;  %v2487_v8 = vor.u32 %v2981_v1, %v2484_v4  ;;  %v3022_v4 = vld [vmem:[%s4514_s1 + $0x88] sm:$0xf0] }
 0x214   :  { %3102 = vrcp.f32 %v744_v19  ;;  %v756_v27 = vand.u32 2147483648, %v744_v19  ;;  %v754_v30 = vand.u32 2147483647, %v744_v19  ;;  %vm750_vm1 = vweird.f32 %v744_v19 }
 0x215   :  { %3104 = vrcp.f32 %v764_v20  ;;  %v776_v42 = vand.u32 2147483648, %v764_v20  ;;  %vm770_vm5 = vweird.f32 %v764_v20  ;;  %v774_v43 = vand.u32 2147483647, %v764_v20 }
 0x216   :  { %v757_v34 = vor.u32 1.1754944e-38, %v756_v27  ;;  %vm755_vm3 = vcmp.eq.f32.partialorder %v754_v30, 8.507059e+37  ;;  %1224 = vmatpush.bf16.msrb.mxu1 %v2547_v13  ;;  %v2991_v27 = vld [vmem:[%s4514_s1 + $0x50] sm:$0xf0] }
 0x217   :  { %v777_v46 = vor.u32 1.1754944e-38, %v776_v42  ;;  %vm775_vm7 = vcmp.eq.f32.partialorder %v774_v43, 8.507059e+37  ;;  %1237 = vmatpush.bf16.msrb.mxu2 %v2551_v14  ;;  %v2988_v42 = vld [vmem:[%s4514_s1 + $0x38] sm:$0xf0] }
 0x21a   :  { %v3103_v21 = vpop.eup %3102 }
 0x21b   :  { %v3105_v23 = vpop.eup %3104  ;;  %v746_v24 = vmul.f32 %v3103_v21, %v744_v19  ;;  %vm751_vm0 = vweird.f32 %v3103_v21  ;;  %v2532_v19 = vld [vmem:[%s4514_s1 + $0x6c] sm:$0xf0] }
 0x21c   :  { %v766_v25 = vmul.f32 %v3105_v23, %v764_v20  ;;  %vm752_vm2 = vmor %vm750_vm1, %vm751_vm0  ;;  %vm771_vm4 = vweird.f32 %v3105_v23  ;;  %v2538_v20 = vld [vmem:[%s4514_s1 + $0x68] sm:$0xf] }
 0x21d   :  { %v747_v26 = vsub.f32 1.0, %v746_v24  ;;  %vm772_vm6 = vmor %vm770_vm5, %vm771_vm4 }
 0x21e   :  { %v767_v28 = vsub.f32 1.0, %v766_v25  ;;  %v2375_v25 = vld [vmem:[%s4517_s0 + $0x48] sm:$0xff] }
 0x21f   :  { %v748_v29 = vmul.f32 %v3103_v21, %v747_v26  ;;  %v2518_v26 = vld [vmem:[%s4514_s1 + $0x48] sm:$0xf] }
 0x220   :  { %v768_v31 = vmul.f32 %v3105_v23, %v767_v28  ;;  %v2990_v28 = vld [vmem:[%s4514_s1 + $0x4c] sm:$0xf]  ;;  %v2519_v30 = vor.u32 %v2991_v27, %v2518_v26 }
 0x221   :  { %v749_v33 = vadd.f32 %v3103_v21, %v748_v29 }
 0x222   :  { %v769_v38 = vadd.f32 %v3105_v23, %v768_v31  ;;  %v2520_v31 = vld [vmem:[%s4514_s1 + $0x54] sm:$0xf0] }
 0x223   :  { %v753_v36 = vsel %vm752_vm2, %v3103_v21, %v749_v33  ;;  %v2995_v21 = vld [vmem:[%s4514_s1 + $0x70] sm:$0xf0]  ;;  %v2526_v33 = vld [vmem:[%s4514_s1 + $0x50] sm:$0xf] }
 0x224   :  { %v758_v37 = vsel %vm755_vm3, %v757_v34, %v753_v36  ;;  %v773_v45 = vsel %vm772_vm6, %v3105_v23, %v769_v38  ;;  %v2535_v23 = vor.u32 %v2993_v17, %v2532_v19  ;;  %v2539_v24 = vor.u32 %v2995_v21, %v2538_v20  ;;  %v2992_v34 = vld [vmem:[%s4514_s1 + $0x58] sm:$0xf0]  ;;  %v2376_v38 = vld [vmem:[%s4517_s0 + $0x50] sm:$0xff] }
 0x225   :  { %v781_v41 = vmul.f32 %v780_v35, %v758_v37  ;;  %v778_v22 = vsel %vm775_vm7, %v777_v46, %v773_v45  ;;  %v2523_v36 = vor.u32 %v2990_v28, %v2520_v31  ;;  %v2527_v37 = vor.u32 %v2992_v34, %v2526_v33  ;;  %v2508_v45 = vld [vmem:[%s4514_s1 + $0x3c] sm:$0xf0]  ;;  %v2514_v46 = vld [vmem:[%s4514_s1 + $0x38] sm:$0xf] }
 0x226   :  { %v784_v47 = vsub.f32 1.0, %v778_v22  ;;  %v786_v50 = vmul.f32 %v778_v22, %v3666_v57  ;;  %v3003_v57 = vld [vmem:[%s4514_s1 + $0xb0] sm:$0xf0]  ;;  %1225 = vmatpush.bf16.msrb.mxu1 %v2535_v23  ;;  %1238 = vmatpush.bf16.msrb.mxu2 %v2539_v24  ;;  %v2377_v28 = vld [vmem:[%s4517_s0 + $0x58] sm:$0xff] }
 0x227   :  { %v782_v44 = vadd.f32 %v2275_v39, %v781_v41  ;;  %v2567_v54 = vor.u32 %v3003_v57, %v2566_v32  ;;  %v2506_v41 = vld [vmem:[%s4514_s1 + $0x30] sm:$0xf]  ;;  %v2494_v32 = vld [vmem:[%s4514_s1 + $0x18] sm:$0xf]  ;;  %v2985_v57 = vld [vmem:[%s4514_s1 + $0x20] sm:$0xf0] }
 0x228   :  { %v2507_v43 = vor.u32 %v2988_v42, %v2506_v41  ;;  %v2495_v55 = vor.u32 %v2985_v57, %v2494_v32  ;;  %v2656_v57 = vld [vmem:[%s4514_s1 + $0x90] sm:$0xf] }
 0x229   :  { %3106 = vtanh.f32 %v782_v44  ;;  %1209 = vmatpush.bf16.msrb.mxu0 %v2567_v54  ;;  %v2987_v44 = vld [vmem:[%s4514_s1 + $0x34] sm:$0xf] }
 0x22a   :  { %1226 = vmatpush.bf16.msrb.mxu1 %v2523_v36  ;;  %1239 = vmatpush.bf16.msrb.mxu2 %v2527_v37  ;;  %v2511_v22 = vor.u32 %v2987_v44, %v2508_v45 }
 0x22d   :  { %1210 = vmatpush.bf16.msrb.mxu0 %v2555_v63  ;;  %v2982_v63 = vld [vmem:[%s4514_s1 + $0x8] sm:$0xf0] }
 0x22e   :  { %1227 = vmatpush.bf16.msrb.mxu1 %v2511_v22  ;;  %v2483_v3 = vor.u32 %v2982_v63, %v2482_v62  ;;  %v3026_v22 = vld [vmem:[%s4514_s1 + $0xac] sm:$0xf]  ;;  %v3021_v62 = vld [vmem:[%s4514_s1 + $0x80] sm:$0xf0]  ;;  %v3020_v63 = vld [vmem:[%s4514_s1 + $0x7c] sm:$0xf] }
 0x22f   :  { %v3107_v48 = vpop.eup %3106 }
 0x230   :  { %v785_v49 = vmul.f32 %v3107_v48, %v784_v47  ;;  %v2989_v47 = vld [vmem:[%s4514_s1 + $0x40] sm:$0xf0] }
 0x231   :  { %1211 = vmatpush.bf16.msrb.mxu0 %v2543_v9  ;;  %v2491_v9 = vor.u32 %v2983_v6, %v2490_v5 }
 0x232   :  { %v3832_v51 = vadd.f32 %v786_v50, %v785_v49  ;;  %v2515_v49 = vor.u32 %v2989_v47, %v2514_v46  ;;  %1228 = vmatpush.bf16.msrb.mxu1 %v2499_v60  ;;  %v2668_v46 = vld [vmem:[%s4514_s1 + $0xa8] sm:$0xf]  ;;  %v2665_v60 = vor.u32 %v3025_v59, %v2664_v58 }
 0x234   :  { %2374 = vst [vmem:[%s4518_s4 + $0x10] sm:$0xff] %v3832_v51  ;;  %v794_v52 = vpack.c.bf16 %v3832_v51, %v3832_v51  ;;  %1240 = vmatpush.bf16.msrb.mxu2 %v2515_v49  ;;  %v2676_v49 = vld [vmem:[%s4514_s1 + $0xb0] sm:$0xf] }
 0x235   :  { %1212 = vmatpush.bf16.msrb.mxu0 %v2531_v18 }
 0x236   :  { %963 = vmatmul.bf16.vlgmr.msra.gmra.mxu1 %v794_v52  ;;  %976 = vmatmul.bf16.vlgmr.msra.gmra.mxu2 %v794_v52 }
 0x237   :  { %989 = vmatmul.bf16.vlgmr.msra.gmra.mxu3 %v794_v52  ;;  %1229 = vmatpush.bf16.msrb.mxu1 %v2487_v8  ;;  %v3018_v8 = vld [vmem:[%s4514_s1 + $0x68] sm:$0xf0] }
 0x238   :  { %1241 = vmatpush.bf16.msrb.mxu2 %v2503_v61  ;;  %v2644_v61 = vld [vmem:[%s4514_s1 + $0x78] sm:$0xf] }
 0x239   :  { %1213 = vmatpush.bf16.msrb.mxu0 %v2519_v30  ;;  %v2645_v1 = vor.u32 %v3021_v62, %v2644_v61  ;;  %v3007_v61 = vld [vmem:[%s4514_s1 + $0x10] sm:$0xf0] }
 0x23c   :  { %1242 = vmatpush.bf16.msrb.mxu2 %v2491_v9  ;;  %v3017_v9 = vld [vmem:[%s4514_s1 + $0x64] sm:$0xf] }
 0x23d   :  { %1214 = vmatpush.bf16.msrb.mxu0 %v2507_v43 }
 0x241   :  { %1215 = vmatpush.bf16.msrb.mxu0 %v2495_v55  ;;  %v2657_v55 = vor.u32 %v3024_v53, %v2656_v57 }
 0x245   :  { %1216 = vmatpush.bf16.msrb.mxu0 %v2483_v3  ;;  %v2652_v3 = vld [vmem:[%s4514_s1 + $0x80] sm:$0xf] }
 0x246   :  { %v2653_v6 = vor.u32 %v3022_v4, %v2652_v3 }
 0x2b3   :  { %v964_v29 = vpop.f32.mrf.mxu1 }
 0x2b4   :  { %v994_v35 = vadd.f32 %v2375_v25, %v964_v29 }
 0x2b6   :  { %v2474_v39 = vmul.f32 -1.442695, %v994_v35 }
 0x2b8   :  { %3108 = vpow2.f32 %v2474_v39 }
 0x2b9   :  { %v977_v48 = vpop.f32.mrf.mxu2 }
 0x2ba   :  { %v1014_v50 = vadd.f32 %v2376_v38, %v977_v48  ;;  %v990_v52 = vpop.f32.mrf.mxu3  ;;  %v2670_v48 = vld [vmem:[%s4514_s1 + $0xb4] sm:$0xf0] }
 0x2bb   :  { %v966_v54 = vpop.f32.mrf.mxu1  ;;  %v1034_v27 = vadd.f32 %v3493_v40, %v990_v52  ;;  %v2673_v52 = vor.u32 %v3026_v22, %v2670_v48  ;;  %v3008_v22 = vld [vmem:[%s4514_s1 + $0x1c] sm:$0xf] }
 0x2bc   :  { %v2475_v0 = vmul.f32 -1.442695, %v1014_v50  ;;  %v3028_v50 = vld [vmem:[%s4514_s1 + $0xb8] sm:$0xf0]  ;;  %v3023_v54 = vld [vmem:[%s4514_s1 + $0x94] sm:$0xf] }
 0x2bd   :  { %v2677_v32 = vor.u32 %v3028_v50, %v2676_v49  ;;  %1476 = vmatpush.bf16.msra.mxu0 %v2673_v52  ;;  %v2598_v50 = vld [vmem:[%s4514_s1 + $0x24] sm:$0xf0]  ;;  %v2604_v52 = vld [vmem:[%s4514_s1 + $0x20] sm:$0xf] }
 0x2be   :  { %v3109_v2 = vpop.eup %3108  ;;  %3110 = vpow2.f32 %v2475_v0  ;;  %v2661_v0 = vor.u32 %v3023_v54, %v2658_v56  ;;  %v2601_v57 = vor.u32 %v3008_v22, %v2598_v50  ;;  %v2584_v54 = vld [vmem:[%s4514_s1] sm:$0xf]  ;;  %v3005_v56 = vld [vmem:[%s4514_s1 + $0x4] sm:$0xf]  ;;  %v3048_v22 = vld [vmem:[%s4514_s1 + $0x98] sm:$0xf0] }
 0x2bf   :  { %v998_v7 = vadd.f32 1.0, %v3109_v2  ;;  %1489 = vmatpush.bf16.msra.mxu1 %v2677_v32  ;;  %v2646_v2 = vld [vmem:[%s4514_s1 + $0x84] sm:$0xf0]  ;;  %v3010_v32 = vld [vmem:[%s4514_s1 + $0x28] sm:$0xf0] }
 0x2c0   :  { %v2649_v5 = vor.u32 %v3020_v63, %v2646_v2  ;;  %v2605_v53 = vor.u32 %v3010_v32, %v2604_v52  ;;  %v2766_v50 = vld [vmem:[%s4514_s1 + $0x98] sm:$0xf]  ;;  %v3049_v52 = vld [vmem:[%s4514_s1 + $0xa0] sm:$0xf0] }
 0x2c1   :  { %3112 = vrcp.f32 %v998_v7  ;;  %v979_v10 = vpop.f32.mrf.mxu2  ;;  %v1010_v17 = vand.u32 2147483648, %v998_v7  ;;  %v1008_v19 = vand.u32 2147483647, %v998_v7  ;;  %vm1004_vm9 = vweird.f32 %v998_v7  ;;  %1477 = vmatpush.bf16.msra.mxu0 %v2661_v0  ;;  %v2586_v0 = vld [vmem:[%s4514_s1 + $0xc] sm:$0xf0] }
 0x2c2   :  { %v992_v11 = vpop.f32.mrf.mxu3 }
 0x2c3   :  { %v1011_v24 = vor.u32 1.1754944e-38, %v1010_v17  ;;  %vm1009_vm11 = vcmp.eq.f32.partialorder %v1008_v19, 8.507059e+37  ;;  %1490 = vmatpush.bf16.msra.mxu1 %v2665_v60  ;;  %v2634_v11 = vld [vmem:[%s4514_s1 + $0x6c] sm:$0xf0]  ;;  %v3015_v19 = vld [vmem:[%s4514_s1 + $0x50] sm:$0xf0] }
 0x2c4   :  { %v3111_v12 = vpop.eup %3110  ;;  %v2592_v60 = vld [vmem:[%s4514_s1 + $0x8] sm:$0xf] }
 0x2c5   :  { %v1018_v13 = vadd.f32 1.0, %v3111_v12  ;;  %1478 = vmatpush.bf16.msra.mxu0 %v2649_v5  ;;  %v2640_v12 = vld [vmem:[%s4514_s1 + $0x68] sm:$0xf]  ;;  %v2593_v2 = vor.u32 %v3007_v61, %v2592_v60  ;;  %v3046_v60 = vld [vmem:[%s4514_s1 + $0x88] sm:$0xf0] }
 0x2c7   :  { %v3113_v14 = vpop.eup %3112  ;;  %3114 = vrcp.f32 %v1018_v13  ;;  %v1030_v31 = vand.u32 2147483648, %v1018_v13  ;;  %v1028_v34 = vand.u32 2147483647, %v1018_v13  ;;  %vm1024_vm13 = vweird.f32 %v1018_v13  ;;  %1491 = vmatpush.bf16.msra.mxu1 %v2653_v6 }
 0x2c8   :  { %v1000_v15 = vmul.f32 %v3113_v14, %v998_v7  ;;  %vm1005_vm8 = vweird.f32 %v3113_v14  ;;  %v2632_v7 = vld [vmem:[%s4514_s1 + $0x60] sm:$0xf] }
 0x2c9   :  { %vm1006_vm10 = vmor %vm1004_vm9, %vm1005_vm8  ;;  %v1031_v37 = vor.u32 1.1754944e-38, %v1030_v31  ;;  %vm1029_vm15 = vcmp.eq.f32.partialorder %v1028_v34, 8.507059e+37  ;;  %v2633_v10 = vor.u32 %v3018_v8, %v2632_v7 }
 0x2ca   :  { %v1001_v16 = vsub.f32 1.0, %v1000_v15  ;;  %v2477_v15 = vld [vmem:[%s4517_s0 + $0x60] sm:$0xff] }
 0x2cc   :  { %v1002_v18 = vmul.f32 %v3113_v14, %v1001_v16  ;;  %v2478_v16 = vld [vmem:[%s4517_s0 + $0x68] sm:$0xff] }
 0x2cd   :  { %v3115_v20 = vpop.eup %3114 }
 0x2ce   :  { %v1020_v21 = vmul.f32 %v3115_v20, %v1018_v13  ;;  %v1003_v23 = vadd.f32 %v3113_v14, %v1002_v18  ;;  %vm1025_vm12 = vweird.f32 %v3115_v20  ;;  %v2637_v13 = vor.u32 %v3017_v9, %v2634_v11  ;;  %v2620_v18 = vld [vmem:[%s4514_s1 + $0x48] sm:$0xf] }
 0x2cf   :  { %vm1026_vm14 = vmor %vm1024_vm13, %vm1025_vm12 }
 0x2d0   :  { %v1021_v25 = vsub.f32 1.0, %v1020_v21  ;;  %v1007_v26 = vsel %vm1006_vm10, %v3113_v14, %v1003_v23  ;;  %v3019_v14 = vld [vmem:[%s4514_s1 + $0x70] sm:$0xf0]  ;;  %1479 = vmatpush.bf16.msra.mxu0 %v2637_v13 }
 0x2d1   :  { %v1012_v29 = vsel %vm1009_vm11, %v1011_v24, %v1007_v26  ;;  %v2641_v17 = vor.u32 %v3019_v14, %v2640_v12  ;;  %v2621_v24 = vor.u32 %v3015_v19, %v2620_v18  ;;  %v2628_v26 = vld [vmem:[%s4514_s1 + $0x50] sm:$0xf]  ;;  %v4156_v18 = vld [vmem:[%s4516_s2] ss:$0 sm:$0xff] }
 0x2d2   :  { %v1022_v30 = vmul.f32 %v3115_v20, %v1021_v25  ;;  %v1035_v33 = vmul.f32 %v1034_v27, %v1012_v29  ;;  %v2622_v25 = vld [vmem:[%s4514_s1 + $0x54] sm:$0xf0]  ;;  %v3016_v27 = vld [vmem:[%s4514_s1 + $0x58] sm:$0xf0] }
 0x2d3   :  { %1492 = vmatpush.bf16.msra.mxu1 %v2641_v17  ;;  %v2629_v31 = vor.u32 %v3016_v27, %v2628_v26 }
 0x2d4   :  { %v1023_v35 = vadd.f32 %v3115_v20, %v1022_v30  ;;  %v1036_v36 = vadd.f32 %v2377_v28, %v1035_v33 }
 0x2d6   :  { %v1027_v38 = vsel %vm1026_vm14, %v3115_v20, %v1023_v35  ;;  %3116 = vtanh.f32 %v1036_v36  ;;  %v3014_v20 = vld [vmem:[%s4514_s1 + $0x4c] sm:$0xf]  ;;  %v2608_v35 = vld [vmem:[%s4514_s1 + $0x30] sm:$0xf]  ;;  %v3012_v36 = vld [vmem:[%s4514_s1 + $0x38] sm:$0xf0] }
 0x2d7   :  { %v1032_v39 = vsel %vm1029_vm15, %v1031_v37, %v1027_v38  ;;  %v2625_v30 = vor.u32 %v3014_v20, %v2622_v25  ;;  %1493 = vmatpush.bf16.msra.mxu1 %v2629_v31  ;;  %v3011_v37 = vld [vmem:[%s4514_s1 + $0x34] sm:$0xf]  ;;  %v2610_v38 = vld [vmem:[%s4514_s1 + $0x3c] sm:$0xf0] }
 0x2d8   :  { %v1038_v40 = vsub.f32 1.0, %v1032_v39  ;;  %v1040_v43 = vmul.f32 %v1032_v39, %v3832_v51  ;;  %v3027_v51 = vld [vmem:[%s4514_s1 + $0xb0] sm:$0xf0]  ;;  %v2609_v39 = vor.u32 %v3012_v36, %v2608_v35 }
 0x2d9   :  { %v2669_v47 = vor.u32 %v3027_v51, %v2668_v46  ;;  %1480 = vmatpush.bf16.msra.mxu0 %v2625_v30  ;;  %v2596_v46 = vld [vmem:[%s4514_s1 + $0x18] sm:$0xf]  ;;  %v3009_v51 = vld [vmem:[%s4514_s1 + $0x20] sm:$0xf0] }
 0x2da   :  { %v2597_v49 = vor.u32 %v3009_v51, %v2596_v46  ;;  %v2758_v51 = vld [vmem:[%s4514_s1 + $0x90] sm:$0xf] }
 0x2db   :  { %1463 = vmatpush.bf16.msrb.mxu3 %v2669_v47 }
 0x2dc   :  { %v3117_v41 = vpop.eup %3116 }
 0x2dd   :  { %v1039_v42 = vmul.f32 %v3117_v41, %v1038_v40  ;;  %v2613_v40 = vor.u32 %v3011_v37, %v2610_v38  ;;  %v2616_v41 = vld [vmem:[%s4514_s1 + $0x38] sm:$0xf]  ;;  %v2770_v38 = vld [vmem:[%s4514_s1 + $0xa8] sm:$0xf] }
 0x2df   :  { %v3995_v44 = vadd.f32 %v1040_v43, %v1039_v42  ;;  %1464 = vmatpush.bf16.msrb.mxu3 %v2657_v55  ;;  %v3013_v42 = vld [vmem:[%s4514_s1 + $0x40] sm:$0xf0]  ;;  %1481 = vmatpush.bf16.msra.mxu0 %v2613_v40  ;;  %v3006_v55 = vld [vmem:[%s4514_s1 + $0x8] sm:$0xf0] }
 0x2e0   :  { %v2617_v43 = vor.u32 %v3013_v42, %v2616_v41  ;;  %v2585_v59 = vor.u32 %v3006_v55, %v2584_v54  ;;  %v2772_v41 = vld [vmem:[%s4514_s1 + $0xb4] sm:$0xf0]  ;;  %v2778_v42 = vld [vmem:[%s4514_s1 + $0xb0] sm:$0xf]  ;;  %v3045_v55 = vld [vmem:[%s4514_s1 + $0x80] sm:$0xf0] }
 0x2e1   :  { %2476 = vst [vmem:[%s4518_s4 + $0x18] sm:$0xff] %v3995_v44  ;;  %v1048_v45 = vpack.c.bf16 %v3995_v44, %v3995_v44  ;;  %v2746_v54 = vld [vmem:[%s4514_s1 + $0x78] sm:$0xf] }
 0x2e2   :  { %1494 = vmatpush.bf16.msra.mxu1 %v2617_v43  ;;  %v3052_v43 = vld [vmem:[%s4514_s1 + $0xb8] sm:$0xf0] }
 0x2e3   :  { %1217 = vmatmul.bf16.vlgmr.msrb.gmra.mxu0 %v1048_v45  ;;  %1230 = vmatmul.bf16.vlgmr.msrb.gmra.mxu1 %v1048_v45  ;;  %v2779_v46 = vor.u32 %v3052_v43, %v2778_v42  ;;  %v3032_v42 = vld [vmem:[%s4514_s1 + $0x1c] sm:$0xf]  ;;  %v2700_v43 = vld [vmem:[%s4514_s1 + $0x24] sm:$0xf0] }
 0x2e4   :  { %1243 = vmatmul.bf16.vlgmr.msrb.gmra.mxu2 %v1048_v45  ;;  %1465 = vmatpush.bf16.msrb.mxu3 %v2645_v1  ;;  %v2589_v1 = vor.u32 %v3005_v56, %v2586_v0  ;;  %v3044_v56 = vld [vmem:[%s4514_s1 + $0x7c] sm:$0xf]  ;;  %v2754_v0 = vld [vmem:[%s4514_s1 + $0x80] sm:$0xf] }
 0x2e5   :  { %1482 = vmatpush.bf16.msra.mxu0 %v2601_v57  ;;  %v2767_v57 = vor.u32 %v3049_v52, %v2766_v50  ;;  %v2686_v50 = vld [vmem:[%s4514_s1] sm:$0xf]  ;;  %v3030_v52 = vld [vmem:[%s4514_s1 + $0x8] sm:$0xf0] }
 0x2e6   :  { %1495 = vmatpush.bf16.msra.mxu1 %v2605_v53  ;;  %v2580_v53 = vld [vmem:[%s4517_s0 + $0x80] sm:$0xff] }
 0x2e8   :  { %1466 = vmatpush.bf16.msrb.mxu3 %v2633_v10 }
 0x2e9   :  { %1483 = vmatpush.bf16.msra.mxu0 %v2589_v1 }
 0x2ea   :  { %1496 = vmatpush.bf16.msra.mxu1 %v2593_v2 }
 0x2ec   :  { %1467 = vmatpush.bf16.msrb.mxu3 %v2621_v24 }
 0x2ed   :  { %1743 = vmatpush.bf16.msrb.mxu0 %v2779_v46 }
 0x2f0   :  { %1468 = vmatpush.bf16.msrb.mxu3 %v2609_v39  ;;  %v3050_v39 = vld [vmem:[%s4514_s1 + $0xac] sm:$0xf] }
 0x2f1   :  { %1744 = vmatpush.bf16.msrb.mxu0 %v2767_v57 }
 0x2f4   :  { %1469 = vmatpush.bf16.msrb.mxu3 %v2597_v49  ;;  %v2760_v49 = vld [vmem:[%s4514_s1 + $0x9c] sm:$0xf0] }
 0x2f8   :  { %1470 = vmatpush.bf16.msrb.mxu3 %v2585_v59  ;;  %v2748_v59 = vld [vmem:[%s4514_s1 + $0x84] sm:$0xf0] }
 0x2f9   :  { %v2751_v61 = vor.u32 %v3044_v56, %v2748_v59  ;;  %v2687_v56 = vor.u32 %v3030_v52, %v2686_v50  ;;  %v2850_v52 = vld [vmem:[%s4514_s1 + $0x84] sm:$0xf0] }
 0x360   :  { %v1218_v21 = vpop.f32.mrf.mxu0  ;;  %v1231_v23 = vpop.f32.mrf.mxu1 }
 0x361   :  { %v1248_v28 = vadd.f32 %v2477_v15, %v1218_v21  ;;  %v1268_v29 = vadd.f32 %v2478_v16, %v1231_v23  ;;  %v2479_v21 = vld [vmem:[%s4517_s0 + $0x70] sm:$0xff] }
 0x363   :  { %v2576_v33 = vmul.f32 -1.442695, %v1248_v28  ;;  %v2577_v34 = vmul.f32 -1.442695, %v1268_v29 }
 0x365   :  { %3118 = vpow2.f32 %v2576_v33 }
 0x366   :  { %3120 = vpow2.f32 %v2577_v34 }
 0x367   :  { %v1244_v45 = vpop.f32.mrf.mxu2 }
 0x368   :  { %v1220_v47 = vpop.f32.mrf.mxu0  ;;  %v1233_v48 = vpop.f32.mrf.mxu1  ;;  %v1288_v19 = vadd.f32 %v4156_v18, %v1244_v45  ;;  %v2775_v45 = vor.u32 %v3050_v39, %v2772_v41  ;;  %v3033_v41 = vld [vmem:[%s4514_s1 + $0x20] sm:$0xf0] }
 0x369   :  { %v3047_v47 = vld [vmem:[%s4514_s1 + $0x94] sm:$0xf]  ;;  %v2759_v48 = vor.u32 %v3048_v22, %v2758_v51  ;;  %v3034_v51 = vld [vmem:[%s4514_s1 + $0x28] sm:$0xf0] }
 0x36a   :  { %1730 = vmatpush.bf16.msra.mxu3 %v2775_v45  ;;  %v2763_v32 = vor.u32 %v3047_v47, %v2760_v49  ;;  %v2706_v45 = vld [vmem:[%s4514_s1 + $0x20] sm:$0xf] }
 0x36b   :  { %v3119_v58 = vpop.eup %3118  ;;  %v2707_v49 = vor.u32 %v3034_v51, %v2706_v45  ;;  %v2868_v45 = vld [vmem:[%s4514_s1 + $0x98] sm:$0xf] }
 0x36c   :  { %v3121_v62 = vpop.eup %3120  ;;  %v1252_v63 = vadd.f32 1.0, %v3119_v58  ;;  %v2747_v58 = vor.u32 %v3045_v55, %v2746_v54  ;;  %v2694_v54 = vld [vmem:[%s4514_s1 + $0x8] sm:$0xf]  ;;  %v3031_v55 = vld [vmem:[%s4514_s1 + $0x10] sm:$0xf0] }
 0x36d   :  { %v1272_v3 = vadd.f32 1.0, %v3121_v62  ;;  %v2755_v62 = vor.u32 %v3046_v60, %v2754_v0  ;;  %v2695_v0 = vor.u32 %v3031_v55, %v2694_v54 }
 0x36e   :  { %3122 = vrcp.f32 %v1252_v63  ;;  %v1264_v11 = vand.u32 2147483648, %v1252_v63  ;;  %v1262_v13 = vand.u32 2147483647, %v1252_v63  ;;  %vm1258_vm1 = vweird.f32 %v1252_v63  ;;  %1731 = vmatpush.bf16.msra.mxu3 %v2763_v32  ;;  %v3029_v32 = vld [vmem:[%s4514_s1 + $0x4] sm:$0xf] }
 0x36f   :  { %3124 = vrcp.f32 %v1272_v3  ;;  %v1246_v4 = vpop.f32.mrf.mxu2  ;;  %v1284_v24 = vand.u32 2147483648, %v1272_v3  ;;  %vm1278_vm5 = vweird.f32 %v1272_v3  ;;  %v1282_v26 = vand.u32 2147483647, %v1272_v3  ;;  %1745 = vmatpush.bf16.msrb.mxu0 %v2755_v62 }
 0x370   :  { %v1265_v16 = vor.u32 1.1754944e-38, %v1264_v11  ;;  %vm1263_vm3 = vcmp.eq.f32.partialorder %v1262_v13, 8.507059e+37  ;;  %v3042_v4 = vld [vmem:[%s4514_s1 + $0x68] sm:$0xf0]  ;;  %v2579_v13 = vld [vmem:[%s4517_s0 + $0x78] sm:$0xff] }
 0x371   :  { %v1285_v29 = vor.u32 1.1754944e-38, %v1284_v24  ;;  %vm1283_vm7 = vcmp.eq.f32.partialorder %v1282_v26, 8.507059e+37 }
 0x372   :  { %1732 = vmatpush.bf16.msra.mxu3 %v2751_v61 }
 0x374   :  { %v3123_v5 = vpop.eup %3122 }
 0x375   :  { %v3125_v6 = vpop.eup %3124  ;;  %v1254_v7 = vmul.f32 %v3123_v5, %v1252_v63  ;;  %vm1259_vm0 = vweird.f32 %v3123_v5 }
 0x376   :  { %v1274_v8 = vmul.f32 %v3125_v6, %v1272_v3  ;;  %vm1260_vm2 = vmor %vm1258_vm1, %vm1259_vm0  ;;  %vm1279_vm4 = vweird.f32 %v3125_v6  ;;  %v2734_v3 = vld [vmem:[%s4514_s1 + $0x60] sm:$0xf] }
 0x377   :  { %v1255_v9 = vsub.f32 1.0, %v1254_v7  ;;  %vm1280_vm6 = vmor %vm1278_vm5, %vm1279_vm4  ;;  %v2736_v7 = vld [vmem:[%s4514_s1 + $0x6c] sm:$0xf0] }
 0x378   :  { %v1275_v10 = vsub.f32 1.0, %v1274_v8  ;;  %v2742_v8 = vld [vmem:[%s4514_s1 + $0x68] sm:$0xf] }
 0x379   :  { %v1256_v12 = vmul.f32 %v3123_v5, %v1255_v9  ;;  %v3043_v9 = vld [vmem:[%s4514_s1 + $0x70] sm:$0xf0] }
 0x37a   :  { %v1276_v14 = vmul.f32 %v3125_v6, %v1275_v10 }
 0x37b   :  { %v1257_v15 = vadd.f32 %v3123_v5, %v1256_v12  ;;  %v2743_v12 = vor.u32 %v3043_v9, %v2742_v8 }
 0x37c   :  { %v1277_v20 = vadd.f32 %v3125_v6, %v1276_v14  ;;  %v2722_v14 = vld [vmem:[%s4514_s1 + $0x48] sm:$0xf] }
 0x37d   :  { %v1261_v17 = vsel %vm1260_vm2, %v3123_v5, %v1257_v15  ;;  %v3041_v5 = vld [vmem:[%s4514_s1 + $0x64] sm:$0xf]  ;;  %1746 = vmatpush.bf16.msrb.mxu0 %v2743_v12  ;;  %v3039_v15 = vld [vmem:[%s4514_s1 + $0x50] sm:$0xf0] }
 0x37e   :  { %v1266_v23 = vsel %vm1263_vm3, %v1265_v16, %v1261_v17  ;;  %v1281_v28 = vsel %vm1280_vm6, %v3125_v6, %v1277_v20  ;;  %v2735_v6 = vor.u32 %v3042_v4, %v2734_v3  ;;  %v2739_v11 = vor.u32 %v3041_v5, %v2736_v7  ;;  %v3038_v16 = vld [vmem:[%s4514_s1 + $0x4c] sm:$0xf]  ;;  %v2724_v20 = vld [vmem:[%s4514_s1 + $0x54] sm:$0xf0] }
 0x37f   :  { %v1289_v25 = vmul.f32 %v1288_v19, %v1266_v23  ;;  %v1286_v30 = vsel %vm1283_vm7, %v1285_v29, %v1281_v28  ;;  %v2723_v19 = vor.u32 %v3039_v15, %v2722_v14  ;;  %v3040_v23 = vld [vmem:[%s4514_s1 + $0x58] sm:$0xf0]  ;;  %v3035_v29 = vld [vmem:[%s4514_s1 + $0x34] sm:$0xf]  ;;  %v2581_v15 = vld [vmem:[%s4517_s0 + $0x88] sm:$0xff] }
 0x380   :  { %v1292_v31 = vsub.f32 1.0, %v1286_v30  ;;  %v1294_v35 = vmul.f32 %v1286_v30, %v3995_v44  ;;  %v3051_v44 = vld [vmem:[%s4514_s1 + $0xb0] sm:$0xf0]  ;;  %1733 = vmatpush.bf16.msra.mxu3 %v2739_v11  ;;  %v3036_v28 = vld [vmem:[%s4514_s1 + $0x38] sm:$0xf0] }
 0x381   :  { %v1290_v27 = vadd.f32 %v2479_v21, %v1289_v25  ;;  %v2771_v40 = vor.u32 %v3051_v44, %v2770_v38  ;;  %v2730_v21 = vld [vmem:[%s4514_s1 + $0x50] sm:$0xf]  ;;  %v2727_v25 = vor.u32 %v3038_v16, %v2724_v20 }
 0x382   :  { %v2731_v26 = vor.u32 %v3040_v23, %v2730_v21 }
 0x383   :  { %3126 = vtanh.f32 %v1290_v27  ;;  %1717 = vmatpush.bf16.msra.mxu2 %v2771_v40  ;;  %v2710_v27 = vld [vmem:[%s4514_s1 + $0x30] sm:$0xf]  ;;  %v2698_v40 = vld [vmem:[%s4514_s1 + $0x18] sm:$0xf] }
 0x384   :  { %1734 = vmatpush.bf16.msra.mxu3 %v2727_v25  ;;  %1747 = vmatpush.bf16.msrb.mxu0 %v2731_v26  ;;  %v2699_v47 = vor.u32 %v3033_v41, %v2698_v40  ;;  %v3072_v40 = vld [vmem:[%s4514_s1 + $0x98] sm:$0xf0]  ;;  %v3071_v41 = vld [vmem:[%s4514_s1 + $0x94] sm:$0xf] }
 0x387   :  { %1718 = vmatpush.bf16.msra.mxu2 %v2759_v48  ;;  %v2703_v48 = vor.u32 %v3032_v42, %v2700_v43  ;;  %v2862_v43 = vld [vmem:[%s4514_s1 + $0x9c] sm:$0xf0] }
 0x388   :  { %v2865_v51 = vor.u32 %v3071_v41, %v2862_v43  ;;  %v2788_v41 = vld [vmem:[%s4514_s1] sm:$0xf]  ;;  %v3053_v43 = vld [vmem:[%s4514_s1 + $0x4] sm:$0xf] }
 0x389   :  { %v3127_v33 = vpop.eup %3126 }
 0x38a   :  { %v1293_v34 = vmul.f32 %v3127_v33, %v1292_v31  ;;  %v2711_v31 = vor.u32 %v3036_v28, %v2710_v27  ;;  %v2712_v33 = vld [vmem:[%s4514_s1 + $0x3c] sm:$0xf0] }
 0x38b   :  { %1719 = vmatpush.bf16.msra.mxu2 %v2747_v58  ;;  %v2715_v44 = vor.u32 %v3035_v29, %v2712_v33 }
 0x38c   :  { %v4163_v36 = vadd.f32 %v1294_v35, %v1293_v34  ;;  %v2718_v34 = vld [vmem:[%s4514_s1 + $0x38] sm:$0xf]  ;;  %v3037_v35 = vld [vmem:[%s4514_s1 + $0x40] sm:$0xf0] }
 0x38d   :  { %v2719_v39 = vor.u32 %v3037_v35, %v2718_v34  ;;  %1735 = vmatpush.bf16.msra.mxu3 %v2715_v44  ;;  %v2874_v34 = vld [vmem:[%s4514_s1 + $0xb4] sm:$0xf0]  ;;  %v2880_v35 = vld [vmem:[%s4514_s1 + $0xb0] sm:$0xf] }
 0x38e   :  { %2578 = vst [vmem:[%s4518_s4 + $0x20] sm:$0xff] %v4163_v36  ;;  %v1302_v37 = vpack.c.bf16 %v4163_v36, %v4163_v36 }
 0x38f   :  { %1720 = vmatpush.bf16.msra.mxu2 %v2735_v6  ;;  %1748 = vmatpush.bf16.msrb.mxu0 %v2719_v39  ;;  %v2860_v39 = vld [vmem:[%s4514_s1 + $0x90] sm:$0xf] }
 0x390   :  { %1471 = vmatmul.bf16.vlgmr.msrb.gmra.mxu3 %v1302_v37  ;;  %1484 = vmatmul.bf16.vlgmr.msra.gmra.mxu0 %v1302_v37  ;;  %v2861_v42 = vor.u32 %v3072_v40, %v2860_v39 }
 0x391   :  { %1497 = vmatmul.bf16.vlgmr.msra.gmra.mxu1 %v1302_v37  ;;  %1736 = vmatpush.bf16.msra.mxu3 %v2703_v48  ;;  %v3069_v48 = vld [vmem:[%s4514_s1 + $0x80] sm:$0xf0] }
 0x393   :  { %1721 = vmatpush.bf16.msra.mxu2 %v2723_v19  ;;  %1749 = vmatpush.bf16.msrb.mxu0 %v2707_v49  ;;  %v3068_v49 = vld [vmem:[%s4514_s1 + $0x7c] sm:$0xf] }
 0x397   :  { %1722 = vmatpush.bf16.msra.mxu2 %v2711_v31  ;;  %1750 = vmatpush.bf16.msrb.mxu0 %v2695_v0  ;;  %v3074_v31 = vld [vmem:[%s4514_s1 + $0xac] sm:$0xf] }
 0x39b   :  { %1723 = vmatpush.bf16.msra.mxu2 %v2699_v47  ;;  %v2848_v47 = vld [vmem:[%s4514_s1 + $0x78] sm:$0xf] }
 0x39c   :  { %v2849_v50 = vor.u32 %v3069_v48, %v2848_v47  ;;  %v3055_v47 = vld [vmem:[%s4514_s1 + $0x10] sm:$0xf0] }
 0x39f   :  { %1724 = vmatpush.bf16.msra.mxu2 %v2687_v56  ;;  %v2836_v56 = vld [vmem:[%s4514_s1 + $0x60] sm:$0xf] }
 0x40d   :  { %v1485_v63 = vpop.f32.mrf.mxu0 }
 0x40e   :  { %v1522_v1 = vadd.f32 %v2580_v53, %v1485_v63  ;;  %v4228_v2 = vpop.f32.mrf.mxu1  ;;  %v2688_v53 = vld [vmem:[%s4514_s1 + $0xc] sm:$0xf0] }
 0x40f   :  { %v2691_v59 = vor.u32 %v3029_v32, %v2688_v53  ;;  %v1542_v11 = vadd.f32 %v4156_v18, %v4228_v2  ;;  %v2856_v32 = vld [vmem:[%s4514_s1 + $0x80] sm:$0xf]  ;;  %v2853_v53 = vor.u32 %v3068_v49, %v2850_v52 }
 0x410   :  { %v2679_v10 = vmul.f32 -1.442695, %v1522_v1 }
 0x411   :  { %1737 = vmatpush.bf16.msra.mxu3 %v2691_v59  ;;  %v3065_v59 = vld [vmem:[%s4514_s1 + $0x64] sm:$0xf] }
 0x412   :  { %3128 = vpow2.f32 %v2679_v10 }
 0x413   :  { %v1472_v17 = vpop.f32.mrf.mxu3 }
 0x414   :  { %v1502_v24 = vadd.f32 %v2579_v13, %v1472_v17 }
 0x415   :  { %v1487_v30 = vpop.f32.mrf.mxu0 }
 0x416   :  { %v2678_v37 = vmul.f32 -1.442695, %v1502_v24  ;;  %v1500_v38 = vpop.f32.mrf.mxu1  ;;  %v2872_v30 = vld [vmem:[%s4514_s1 + $0xa8] sm:$0xf] }
 0x417   :  { %v2877_v38 = vor.u32 %v3074_v31, %v2874_v34  ;;  %v2800_v31 = vld [vmem:[%s4514_s1 + $0x18] sm:$0xf]  ;;  %v3056_v34 = vld [vmem:[%s4514_s1 + $0x1c] sm:$0xf] }
 0x418   :  { %v3129_v46 = vpop.eup %3128  ;;  %3130 = vpow2.f32 %v2678_v37  ;;  %v3076_v37 = vld [vmem:[%s4514_s1 + $0xb8] sm:$0xf0] }
 0x419   :  { %v1526_v22 = vadd.f32 1.0, %v3129_v46  ;;  %v2881_v44 = vor.u32 %v3076_v37, %v2880_v35  ;;  %1984 = vmatpush.bf16.msrb.mxu2 %v2877_v38  ;;  %v3073_v46 = vld [vmem:[%s4514_s1 + $0xa0] sm:$0xf0]  ;;  %v2802_v35 = vld [vmem:[%s4514_s1 + $0x24] sm:$0xf0] }
 0x41a   :  { %v2808_v37 = vld [vmem:[%s4514_s1 + $0x20] sm:$0xf]  ;;  %v3058_v38 = vld [vmem:[%s4514_s1 + $0x28] sm:$0xf0]  ;;  %v2805_v39 = vor.u32 %v3056_v34, %v2802_v35 }
 0x41b   :  { %v1474_v57 = vpop.f32.mrf.mxu3  ;;  %3132 = vrcp.f32 %v1526_v22  ;;  %v1538_v16 = vand.u32 2147483648, %v1526_v22  ;;  %vm1532_vm13 = vweird.f32 %v1526_v22  ;;  %v1536_v19 = vand.u32 2147483647, %v1526_v22  ;;  %1997 = vmatpush.bf16.msrb.mxu3 %v2881_v44 }
 0x41c   :  { %v3070_v57 = vld [vmem:[%s4514_s1 + $0x88] sm:$0xf0]  ;;  %v2809_v40 = vor.u32 %v3058_v38, %v2808_v37 }
 0x41d   :  { %v1539_v23 = vor.u32 1.1754944e-38, %v1538_v16  ;;  %vm1537_vm15 = vcmp.eq.f32.partialorder %v1536_v19, 8.507059e+37  ;;  %1985 = vmatpush.bf16.msrb.mxu2 %v2865_v51  ;;  %v2857_v54 = vor.u32 %v3070_v57, %v2856_v32  ;;  %v2812_v19 = vld [vmem:[%s4514_s1 + $0x30] sm:$0xf] }
 0x41e   :  { %v3131_v58 = vpop.eup %3130  ;;  %v2790_v51 = vld [vmem:[%s4514_s1 + $0xc] sm:$0xf0] }
 0x41f   :  { %v1506_v60 = vadd.f32 1.0, %v3131_v58  ;;  %v3066_v58 = vld [vmem:[%s4514_s1 + $0x68] sm:$0xf0] }
 0x420   :  { %v2837_v0 = vor.u32 %v3066_v58, %v2836_v56 }
 0x421   :  { %3134 = vrcp.f32 %v1506_v60  ;;  %v3133_v61 = vpop.eup %3132  ;;  %v1518_v5 = vand.u32 2147483648, %v1506_v60  ;;  %v1516_v7 = vand.u32 2147483647, %v1506_v60  ;;  %vm1512_vm9 = vweird.f32 %v1506_v60  ;;  %1986 = vmatpush.bf16.msrb.mxu2 %v2853_v53 }
 0x422   :  { %v1528_v62 = vmul.f32 %v3133_v61, %v1526_v22  ;;  %vm1533_vm12 = vweird.f32 %v3133_v61  ;;  %v2869_v22 = vor.u32 %v3073_v46, %v2868_v45 }
 0x423   :  { %v1519_v10 = vor.u32 1.1754944e-38, %v1518_v5  ;;  %vm1517_vm11 = vcmp.eq.f32.partialorder %v1516_v7, 8.507059e+37  ;;  %vm1534_vm14 = vmor %vm1532_vm13, %vm1533_vm12  ;;  %v2824_v5 = vld [vmem:[%s4514_s1 + $0x48] sm:$0xf]  ;;  %v3062_v7 = vld [vmem:[%s4514_s1 + $0x4c] sm:$0xf] }
 0x424   :  { %v1529_v3 = vsub.f32 1.0, %v1528_v62  ;;  %1998 = vmatpush.bf16.msrb.mxu3 %v2869_v22  ;;  %v3067_v62 = vld [vmem:[%s4514_s1 + $0x70] sm:$0xf0]  ;;  %v2796_v22 = vld [vmem:[%s4514_s1 + $0x8] sm:$0xf] }
 0x425   :  { %v2797_v52 = vor.u32 %v3055_v47, %v2796_v22 }
 0x426   :  { %v1530_v8 = vmul.f32 %v3133_v61, %v1529_v3  ;;  %v2681_v3 = vld [vmem:[%s4517_s0 + $0x90] sm:$0xff] }
 0x427   :  { %v3135_v63 = vpop.eup %3134 }
 0x428   :  { %v1508_v1 = vmul.f32 %v3135_v63, %v1506_v60  ;;  %vm1513_vm8 = vweird.f32 %v3135_v63  ;;  %v1531_v13 = vadd.f32 %v3133_v61, %v1530_v8  ;;  %1999 = vmatpush.bf16.msrb.mxu3 %v2857_v54  ;;  %v2838_v60 = vld [vmem:[%s4514_s1 + $0x6c] sm:$0xf0] }
 0x429   :  { %vm1514_vm10 = vmor %vm1512_vm9, %vm1513_vm8 }
 0x42a   :  { %v1509_v4 = vsub.f32 1.0, %v1508_v1  ;;  %v1535_v21 = vsel %vm1534_vm14, %v3133_v61, %v1531_v13  ;;  %v2844_v61 = vld [vmem:[%s4514_s1 + $0x68] sm:$0xf]  ;;  %v3064_v13 = vld [vmem:[%s4514_s1 + $0x58] sm:$0xf0] }
 0x42b   :  { %v1540_v2 = vsel %vm1537_vm15, %v1539_v23, %v1535_v21  ;;  %v2845_v1 = vor.u32 %v3067_v62, %v2844_v61  ;;  %v3059_v21 = vld [vmem:[%s4514_s1 + $0x34] sm:$0xf] }
 0x42c   :  { %v1510_v6 = vmul.f32 %v3135_v63, %v1509_v4  ;;  %v1546_v24 = vsub.f32 1.0, %v1540_v2  ;;  %v1548_v27 = vmul.f32 %v1540_v2, %v4163_v36  ;;  %v3075_v36 = vld [vmem:[%s4514_s1 + $0xb0] sm:$0xf0]  ;;  %v2682_v4 = vld [vmem:[%s4517_s0 + $0x98] sm:$0xff]  ;;  %v2814_v2 = vld [vmem:[%s4514_s1 + $0x3c] sm:$0xf0] }
 0x42d   :  { %v2873_v33 = vor.u32 %v3075_v36, %v2872_v30  ;;  %2000 = vmatpush.bf16.msrb.mxu3 %v2845_v1  ;;  %v2817_v30 = vor.u32 %v3059_v21, %v2814_v2  ;;  %v2783_v2 = vld [vmem:[%s4517_s0 + $0xa8] sm:$0xff] }
 0x42e   :  { %v1511_v9 = vadd.f32 %v3135_v63, %v1510_v6  ;;  %v3063_v6 = vld [vmem:[%s4514_s1 + $0x50] sm:$0xf0] }
 0x42f   :  { %1971 = vmatpush.bf16.msrb.mxu1 %v2873_v33  ;;  %v3057_v33 = vld [vmem:[%s4514_s1 + $0x20] sm:$0xf0] }
 0x430   :  { %v1515_v12 = vsel %vm1514_vm10, %v3135_v63, %v1511_v9  ;;  %v2841_v63 = vor.u32 %v3065_v59, %v2838_v60  ;;  %v2801_v44 = vor.u32 %v3057_v33, %v2800_v31 }
 0x431   :  { %v1520_v14 = vsel %vm1517_vm11, %v1519_v10, %v1515_v12  ;;  %v2825_v10 = vor.u32 %v3063_v6, %v2824_v5  ;;  %v2832_v12 = vld [vmem:[%s4514_s1 + $0x50] sm:$0xf] }
 0x432   :  { %v1543_v17 = vmul.f32 %v1542_v11, %v1520_v14  ;;  %1987 = vmatpush.bf16.msrb.mxu2 %v2841_v63  ;;  %v2826_v11 = vld [vmem:[%s4514_s1 + $0x54] sm:$0xf0] }
 0x433   :  { %1972 = vmatpush.bf16.msrb.mxu1 %v2861_v42  ;;  %v2829_v16 = vor.u32 %v3062_v7, %v2826_v11  ;;  %v3054_v42 = vld [vmem:[%s4514_s1 + $0x8] sm:$0xf0] }
 0x434   :  { %v1544_v20 = vadd.f32 %v2581_v15, %v1543_v17  ;;  %v2833_v17 = vor.u32 %v3064_v13, %v2832_v12  ;;  %v2789_v48 = vor.u32 %v3054_v42, %v2788_v41 }
 0x436   :  { %3136 = vtanh.f32 %v1544_v20  ;;  %v3060_v20 = vld [vmem:[%s4514_s1 + $0x38] sm:$0xf0]  ;;  %1988 = vmatpush.bf16.msrb.mxu2 %v2829_v16  ;;  %2001 = vmatpush.bf16.msrb.mxu3 %v2833_v17 }
 0x437   :  { %1973 = vmatpush.bf16.msrb.mxu1 %v2849_v50  ;;  %v2813_v23 = vor.u32 %v3060_v20, %v2812_v19  ;;  %v2793_v50 = vor.u32 %v3053_v43, %v2790_v51 }
 0x43a   :  { %1989 = vmatpush.bf16.msrb.mxu2 %v2817_v30 }
 0x43b   :  { %1974 = vmatpush.bf16.msrb.mxu1 %v2837_v0 }
 0x43c   :  { %v3137_v25 = vpop.eup %3136 }
 0x43d   :  { %v1547_v26 = vmul.f32 %v3137_v25, %v1546_v24  ;;  %v2820_v24 = vld [vmem:[%s4514_s1 + $0x38] sm:$0xf]  ;;  %v3061_v25 = vld [vmem:[%s4514_s1 + $0x40] sm:$0xf0] }
 0x43e   :  { %v2821_v36 = vor.u32 %v3061_v25, %v2820_v24  ;;  %1990 = vmatpush.bf16.msrb.mxu2 %v2805_v39 }
 0x43f   :  { %v4329_v28 = vadd.f32 %v1548_v27, %v1547_v26  ;;  %1975 = vmatpush.bf16.msrb.mxu1 %v2825_v10 }
 0x440   :  { %2002 = vmatpush.bf16.msrb.mxu3 %v2821_v36 }
 0x441   :  { %2680 = vst [vmem:[%s4518_s4 + $0x28] sm:$0xff] %v4329_v28  ;;  %v1556_v29 = vpack.c.bf16 %v4329_v28, %v4329_v28 }
 0x442   :  { %1991 = vmatpush.bf16.msrb.mxu2 %v2793_v50 }
 0x443   :  { %1725 = vmatmul.bf16.vlgmr.msra.gmra.mxu2 %v1556_v29  ;;  %1738 = vmatmul.bf16.vlgmr.msra.gmra.mxu3 %v1556_v29 }
 0x444   :  { %1751 = vmatmul.bf16.vlgmr.msrb.gmra.mxu0 %v1556_v29  ;;  %1976 = vmatpush.bf16.msrb.mxu1 %v2813_v23 }
 0x445   :  { %2003 = vmatpush.bf16.msrb.mxu3 %v2809_v40 }
 0x448   :  { %1977 = vmatpush.bf16.msrb.mxu1 %v2801_v44 }
 0x449   :  { %2004 = vmatpush.bf16.msrb.mxu3 %v2797_v52  ;;  %v2785_v52 = vld [vmem:[%s4517_s0 + $0xb8] sm:$0xff] }
 0x44c   :  { %1978 = vmatpush.bf16.msrb.mxu1 %v2789_v48 }
 0x4c1   :  { %v4391_v55 = vpop.f32.mrf.mxu0 }
 0x4c2   :  { %v1796_v5 = vadd.f32 %v4156_v18, %v4391_v55 }
 0x4c6   :  { %v1726_v8 = vpop.f32.mrf.mxu2  ;;  %v1739_v9 = vpop.f32.mrf.mxu3 }
 0x4c7   :  { %v1756_v14 = vadd.f32 %v2681_v3, %v1726_v8  ;;  %v1776_v15 = vadd.f32 %v2682_v4, %v1739_v9  ;;  %v2683_v9 = vld [vmem:[%s4517_s0 + $0xa0] sm:$0xff] }
 0x4c9   :  { %v2780_v26 = vmul.f32 -1.442695, %v1756_v14  ;;  %v2781_v27 = vmul.f32 -1.442695, %v1776_v15  ;;  %v1754_v29 = vpop.f32.mrf.mxu0 }
 0x4cb   :  { %3138 = vpow2.f32 %v2780_v26 }
 0x4cc   :  { %3140 = vpow2.f32 %v2781_v27 }
 0x4ce   :  { %v1728_v45 = vpop.f32.mrf.mxu2  ;;  %v1741_v46 = vpop.f32.mrf.mxu3 }
 0x4d1   :  { %v3139_v49 = vpop.eup %3138 }
 0x4d2   :  { %v3141_v32 = vpop.eup %3140  ;;  %v1760_v57 = vadd.f32 1.0, %v3139_v49 }
 0x4d3   :  { %v1780_v53 = vadd.f32 1.0, %v3141_v32 }
 0x4d4   :  { %3142 = vrcp.f32 %v1760_v57  ;;  %v1772_v60 = vand.u32 2147483648, %v1760_v57  ;;  %v1770_v63 = vand.u32 2147483647, %v1760_v57  ;;  %vm1766_vm1 = vweird.f32 %v1760_v57 }
 0x4d5   :  { %3144 = vrcp.f32 %v1780_v53  ;;  %v1792_v11 = vand.u32 2147483648, %v1780_v53  ;;  %vm1786_vm5 = vweird.f32 %v1780_v53  ;;  %v1790_v12 = vand.u32 2147483647, %v1780_v53 }
 0x4d6   :  { %v1773_v4 = vor.u32 1.1754944e-38, %v1772_v60  ;;  %vm1771_vm3 = vcmp.eq.f32.partialorder %v1770_v63, 8.507059e+37 }
 0x4d7   :  { %v1793_v15 = vor.u32 1.1754944e-38, %v1792_v11  ;;  %vm1791_vm7 = vcmp.eq.f32.partialorder %v1790_v12, 8.507059e+37 }
 0x4da   :  { %v3143_v54 = vpop.eup %3142 }
 0x4db   :  { %v3145_v56 = vpop.eup %3144  ;;  %v1762_v58 = vmul.f32 %v3143_v54, %v1760_v57  ;;  %vm1767_vm0 = vweird.f32 %v3143_v54 }
 0x4dc   :  { %v1782_v59 = vmul.f32 %v3145_v56, %v1780_v53  ;;  %vm1768_vm2 = vmor %vm1766_vm1, %vm1767_vm0  ;;  %vm1787_vm4 = vweird.f32 %v3145_v56 }
 0x4dd   :  { %v1763_v0 = vsub.f32 1.0, %v1762_v58  ;;  %vm1788_vm6 = vmor %vm1786_vm5, %vm1787_vm4 }
 0x4de   :  { %v1783_v61 = vsub.f32 1.0, %v1782_v59 }
 0x4df   :  { %v1764_v62 = vmul.f32 %v3143_v54, %v1763_v0 }
 0x4e0   :  { %v1784_v1 = vmul.f32 %v3145_v56, %v1783_v61 }
 0x4e1   :  { %v1765_v3 = vadd.f32 %v3143_v54, %v1764_v62 }
 0x4e2   :  { %v1785_v8 = vadd.f32 %v3145_v56, %v1784_v1 }
 0x4e3   :  { %v1769_v6 = vsel %vm1768_vm2, %v3143_v54, %v1765_v3 }
 0x4e4   :  { %v1774_v7 = vsel %vm1771_vm3, %v1773_v4, %v1769_v6  ;;  %v1789_v14 = vsel %vm1788_vm6, %v3145_v56, %v1785_v8 }
 0x4e5   :  { %v1797_v10 = vmul.f32 %v1796_v5, %v1774_v7  ;;  %v1794_v55 = vsel %vm1791_vm7, %v1793_v15, %v1789_v14 }
 0x4e6   :  { %v1800_v16 = vsub.f32 1.0, %v1794_v55  ;;  %v1802_v20 = vmul.f32 %v1794_v55, %v4329_v28  ;;  %v2784_v28 = vld [vmem:[%s4517_s0 + $0xb0] sm:$0xff] }
 0x4e7   :  { %v1798_v13 = vadd.f32 %v2683_v9, %v1797_v10 }
 0x4e9   :  { %3146 = vtanh.f32 %v1798_v13 }
 0x4ef   :  { %v3147_v17 = vpop.eup %3146 }
 0x4f0   :  { %v1801_v19 = vmul.f32 %v3147_v17, %v1800_v16 }
 0x4f2   :  { %v1803_v21 = vadd.f32 %v1802_v20, %v1801_v19 }
 0x4f4   :  { %2782 = vst [vmem:[%s4518_s4 + $0x30] sm:$0xff] %v1803_v21  ;;  %v1810_v23 = vpack.c.bf16 %v1803_v21, %v1803_v21 }
 0x4f6   :  { %1979 = vmatmul.bf16.vlgmr.msrb.gmra.mxu1 %v1810_v23  ;;  %1992 = vmatmul.bf16.vlgmr.msrb.gmra.mxu2 %v1810_v23 }
 0x4f7   :  { %2005 = vmatmul.bf16.vlgmr.msrb.gmra.mxu3 %v1810_v23 }
 0x573   :  { %v1980_v24 = vpop.f32.mrf.mxu1 }
 0x574   :  { %v2010_v25 = vadd.f32 %v2783_v2, %v1980_v24 }
 0x576   :  { %v2882_v26 = vmul.f32 -1.442695, %v2010_v25 }
 0x578   :  { %3148 = vpow2.f32 %v2882_v26 }
 0x579   :  { %v1993_v27 = vpop.f32.mrf.mxu2 }
 0x57a   :  { %v2030_v29 = vadd.f32 %v2784_v28, %v1993_v27  ;;  %v2006_v30 = vpop.f32.mrf.mxu3 }
 0x57b   :  { %v1982_v36 = vpop.f32.mrf.mxu1  ;;  %v2050_v50 = vadd.f32 %v4156_v18, %v2006_v30 }
 0x57c   :  { %v2883_v31 = vmul.f32 -1.442695, %v2030_v29 }
 0x57e   :  { %v3149_v33 = vpop.eup %3148  ;;  %3150 = vpow2.f32 %v2883_v31 }
 0x57f   :  { %v2014_v34 = vadd.f32 1.0, %v3149_v33 }
 0x581   :  { %3152 = vrcp.f32 %v2014_v34  ;;  %v1995_v35 = vpop.f32.mrf.mxu2  ;;  %v2026_v42 = vand.u32 2147483648, %v2014_v34  ;;  %v2024_v45 = vand.u32 2147483647, %v2014_v34  ;;  %vm2020_vm9 = vweird.f32 %v2014_v34 }
 0x582   :  { %v2008_v37 = vpop.f32.mrf.mxu3 }
 0x583   :  { %v2027_v47 = vor.u32 1.1754944e-38, %v2026_v42  ;;  %vm2025_vm11 = vcmp.eq.f32.partialorder %v2024_v45, 8.507059e+37 }
 0x584   :  { %v3151_v38 = vpop.eup %3150 }
 0x585   :  { %v2034_v44 = vadd.f32 1.0, %v3151_v38 }
 0x587   :  { %v3153_v39 = vpop.eup %3152  ;;  %3154 = vrcp.f32 %v2034_v44  ;;  %v2046_v53 = vand.u32 2147483648, %v2034_v44  ;;  %v2044_v56 = vand.u32 2147483647, %v2034_v44  ;;  %vm2040_vm13 = vweird.f32 %v2034_v44 }
 0x588   :  { %v2016_v40 = vmul.f32 %v3153_v39, %v2014_v34  ;;  %vm2021_vm8 = vweird.f32 %v3153_v39 }
 0x589   :  { %vm2022_vm10 = vmor %vm2020_vm9, %vm2021_vm8  ;;  %v2047_v0 = vor.u32 1.1754944e-38, %v2046_v53  ;;  %vm2045_vm15 = vcmp.eq.f32.partialorder %v2044_v56, 8.507059e+37 }
 0x58a   :  { %v2017_v41 = vsub.f32 1.0, %v2016_v40 }
 0x58c   :  { %v2018_v43 = vmul.f32 %v3153_v39, %v2017_v41 }
 0x58d   :  { %v3155_v46 = vpop.eup %3154 }
 0x58e   :  { %v2036_v51 = vmul.f32 %v3155_v46, %v2034_v44  ;;  %v2019_v22 = vadd.f32 %v3153_v39, %v2018_v43  ;;  %vm2041_vm12 = vweird.f32 %v3155_v46 }
 0x58f   :  { %vm2042_vm14 = vmor %vm2040_vm13, %vm2041_vm12 }
 0x590   :  { %v2037_v48 = vsub.f32 1.0, %v2036_v51  ;;  %v2023_v49 = vsel %vm2022_vm10, %v3153_v39, %v2019_v22 }
 0x591   :  { %v2028_v32 = vsel %vm2025_vm11, %v2027_v47, %v2023_v49 }
 0x592   :  { %v2038_v57 = vmul.f32 %v3155_v46, %v2037_v48  ;;  %v2051_v54 = vmul.f32 %v2050_v50, %v2028_v32 }
 0x594   :  { %v2039_v58 = vadd.f32 %v3155_v46, %v2038_v57  ;;  %v2052_v59 = vadd.f32 %v2785_v52, %v2051_v54 }
 0x596   :  { %v2043_v60 = vsel %vm2042_vm14, %v3155_v46, %v2039_v58  ;;  %3156 = vtanh.f32 %v2052_v59 }
 0x597   :  { %v2048_v61 = vsel %vm2045_vm15, %v2047_v0, %v2043_v60 }
 0x598   :  { %v2054_v18 = vsub.f32 1.0, %v2048_v61  ;;  %v2056_v1 = vmul.f32 %v2048_v61, %v1803_v21 }
 0x59c   :  { %v3157_v62 = vpop.eup %3156 }
 0x59d   :  { %v2055_v63 = vmul.f32 %v3157_v62, %v2054_v18 }
 0x59f   :  { %v2057_v3 = vadd.f32 %v2056_v1, %v2055_v63 }
 0x5a1   :  { %2884 = vst [vmem:[%s4518_s4 + $0x38] sm:$0xff] %v2057_v3 }
 0x5a2   :  { %2064 = vst [vmem:[%s4519_s5] sm:$0xff] %v2057_v3 }

</bundles_post_ra>
